<compile_context>
chip_gen: v6e
topology: v6e:2x2x1
jax: 0.10.0
libtpu: 0.0.40
codegen_flags: <defaults>
</compile_context>

<pallas_src>
import functools
import math

import numpy as np

import jax
import jax.numpy as jnp
from jax.experimental import pallas as pl
from jax.experimental.pallas import tpu as pltpu


def _vmem_capacity_bytes():
    try:
        return int(pltpu.get_tpu_info().vmem_capacity_bytes)
    except Exception:
        return 64 << 20  # conservative fallback (v7x per-core VMEM)


def _fused_lstm_kernel(x_ref, w_in0_hbm, w_in_hbm, w_hh_hbm, b_hbm,
                       hn_ref,
                       w_in0_sc, w_in_sc, w_hh_sc, b_sc, gx_sc, hseq_sc,
                       h_sc, c_sc, load_sem, *,
                       seq_len, chunk, batch_p, hidden, num_layers, ragged,
                       unroll):
    """Fused multi-layer LSTM over one chunk of timesteps.

    x_ref:   (chunk*Bp, D)   flat time-major input rows (row = t*Bp + b)
    w_*_hbm: weights/bias left in HBM (pl.ANY), staged once at chunk 0
    hn_ref:  (Bp, H)         output: last layer's hidden state (final step)
    gx_sc:   (chunk*Bp, 4H)  precomputed input-projection gates (per layer)
    hseq_sc: (chunk*Bp, H)   current layer's h sequence (input of next layer)
    h_sc/c_sc: (L, Bp, H)    recurrent state carried across grid steps
    """
    H, L, Bp = hidden, num_layers, batch_p
    cidx = pl.program_id(0)

    @pl.when(cidx == 0)
    def _init():
        # Single-buffered, one-time weight staging (grid-invariant operands).
        copies = (
            pltpu.make_async_copy(w_in0_hbm, w_in0_sc, load_sem.at[0]),
            pltpu.make_async_copy(w_in_hbm, w_in_sc, load_sem.at[1]),
            pltpu.make_async_copy(w_hh_hbm, w_hh_sc, load_sem.at[2]),
            pltpu.make_async_copy(b_hbm, b_sc, load_sem.at[3]),
        )
        for cp in copies:
            cp.start()
        for cp in copies:
            cp.wait()
        h_sc[...] = jnp.zeros_like(h_sc)
        c_sc[...] = jnp.zeros_like(c_sc)

    chunk_start = cidx * chunk
    last_h = None

    for l in range(L):
        # ---- (1) batched input projection over the whole chunk (big MXU dot,
        #          M = chunk*Bp rows) + bias added once per chunk. ----
        if l == 0:
            xin = x_ref[...]                       # (chunk*Bp, D)
            w_x = w_in0_sc[...]                    # (D, 4H)
        else:
            xin = hseq_sc[...]                     # (chunk*Bp, H)
            w_x = w_in_sc[l - 1]                   # (H, 4H)
        gx = jnp.dot(xin.astype(w_x.dtype), w_x,
                     preferred_element_type=jnp.float32)
        gx_sc[...] = gx + b_sc[l]                  # (chunk*Bp, 4H) f32

        # ---- (2) sequential recurrence: only the small (Bp,H)@(H,4H) dot. ----
        h0 = h_sc[l]                               # (Bp, H) f32
        c0 = c_sc[l]
        w_hh_dtype = w_hh_sc.dtype

        def step(i, carry, l=l):
            h_prev, c_prev = carry
            row = pl.multiple_of(i * Bp, 8)        # 8-aligned sublane offset
            g = gx_sc[pl.ds(row, Bp), :] + jnp.dot(
                h_prev.astype(w_hh_dtype), w_hh_sc[l],
                preferred_element_type=jnp.float32)
            # Gate columns were packed as [i, f, o | g]: sigmoid on 3H cols,
            # tanh on H cols (half the EUP work of full-width sig+tanh+select).
            sg = jax.nn.sigmoid(g[:, :3 * H])
            gg = jnp.tanh(g[:, 3 * H:])
            i_g = sg[:, 0 * H:1 * H]
            f_g = sg[:, 1 * H:2 * H]
            o_g = sg[:, 2 * H:3 * H]
            c_new = f_g * c_prev + i_g * gg
            h_new = o_g * jnp.tanh(c_new)
            if ragged:
                # Padded (t >= seq_len) timesteps must not update the state.
                keep = ((chunk_start + i) < seq_len).astype(jnp.float32)
                h_new = keep * h_new + (1.0 - keep) * h_prev
                c_new = keep * c_new + (1.0 - keep) * c_prev
            if l < L - 1:
                hseq_sc[pl.ds(row, Bp), :] = h_new
            return h_new, c_new

        h_f, c_f = jax.lax.fori_loop(0, chunk, step, (h0, c0), unroll=unroll)
        h_sc[l] = h_f
        c_sc[l] = c_f
        last_h = h_f

    # Only hn[-1] is consumed downstream; emit just that (Bp, H) block.
    hn_ref[...] = last_h.astype(hn_ref.dtype)


def _fused_lstm(x_flat, w_in0, w_in, w_hh, bias, *, seq_len, chunk, batch_p,
                in_dim, hidden, num_layers, ragged, unroll, vmem_limit):
    Bp, D, H, L = batch_p, in_dim, hidden, num_layers
    G = 4 * H
    rows = x_flat.shape[0]
    num_chunks = rows // (chunk * Bp)
    hseq_rows = chunk * Bp if L > 1 else 8   # unused scratch kept tiny for L==1

    kernel = functools.partial(
        _fused_lstm_kernel, seq_len=seq_len, chunk=chunk, batch_p=Bp,
        hidden=H, num_layers=L, ragged=ragged, unroll=unroll)

    return pl.pallas_call(
        kernel,
        out_shape=jax.ShapeDtypeStruct((Bp, H), jnp.float32),
        grid_spec=pltpu.PrefetchScalarGridSpec(
            num_scalar_prefetch=0,
            grid=(num_chunks,),
            in_specs=[
                pl.BlockSpec((chunk * Bp, D), lambda c: (c, 0)),   # x chunk
                pl.BlockSpec(memory_space=pl.ANY),                 # w_in0
                pl.BlockSpec(memory_space=pl.ANY),                 # w_in (1..L-1)
                pl.BlockSpec(memory_space=pl.ANY),                 # w_hh
                pl.BlockSpec(memory_space=pl.ANY),                 # bias
            ],
            out_specs=pl.BlockSpec((Bp, H), lambda c: (0, 0)),
            scratch_shapes=[
                pltpu.VMEM(w_in0.shape, w_in0.dtype),   # staged layer-0 W_ih^T
                pltpu.VMEM(w_in.shape, w_in.dtype),     # staged W_ih^T (l>=1)
                pltpu.VMEM(w_hh.shape, w_hh.dtype),     # staged W_hh^T
                pltpu.VMEM(bias.shape, bias.dtype),     # staged bias
                pltpu.VMEM((chunk * Bp, G), jnp.float32),   # gx: input gates
                pltpu.VMEM((hseq_rows, H), jnp.float32),    # layer h-sequence
                pltpu.VMEM((L, Bp, H), jnp.float32),        # h carry
                pltpu.VMEM((L, Bp, H), jnp.float32),        # c carry
                pltpu.SemaphoreType.DMA((4,)),              # weight-load sems
            ],
        ),
        compiler_params=pltpu.CompilerParams(
            dimension_semantics=("arbitrary",),   # time recurrence: sequential
            vmem_limit_bytes=int(vmem_limit),
        ),
    )(x_flat, w_in0, w_in, w_hh, bias)


class LSTMFeatureExtractorPallas:
    """JAX/Pallas equivalent of the PyTorch LSTMFeatureExtractor (returns hn[-1])."""

    _MAX_CHUNK_T = 1024   # cap on timesteps staged per grid step

    def __init__(self, input_dim, hidden_dim, num_layers, key,
                 param_dtype=jnp.float32):
        self.input_dim = int(input_dim)
        self.hidden_dim = int(hidden_dim)
        self.num_layers = int(num_layers)
        self.param_dtype = np.dtype(param_dtype)
        # x is staged in the param dtype (halves DMA bytes for bf16 params);
        # all recurrent / elementwise math stays f32 inside the kernel.
        self.x_dtype = self.param_dtype

        H, D, L = self.hidden_dim, self.input_dim, self.num_layers
        k = 1.0 / math.sqrt(H)

        def reorder(w):
            # PyTorch gate order on the 4H axis is [i, f, g, o]; repack to
            # [i, f, o, g] so sigmoid/tanh each act on one contiguous slab.
            return jnp.concatenate(
                [w[..., 0:H], w[..., H:2 * H], w[..., 3 * H:4 * H],
                 w[..., 2 * H:3 * H]], axis=-1)

        self.raw_params = []   # kept for the pure-JAX reference check
        w_in_layers, w_hh_layers, b_layers = [], [], []
        for layer in range(L):
            d_in = D if layer == 0 else H
            key, k1, k2, k3, k4 = jax.random.split(key, 5)
            # PyTorch shapes: weight_ih (4H, d_in), weight_hh (4H, H), biases (4H,).
            w_ih = jax.random.uniform(k1, (4 * H, d_in), jnp.float32, -k, k)
            w_hh = jax.random.uniform(k2, (4 * H, H), jnp.float32, -k, k)
            b_ih = jax.random.uniform(k3, (4 * H,), jnp.float32, -k, k)
            b_hh = jax.random.uniform(k4, (4 * H,), jnp.float32, -k, k)
            self.raw_params.append((w_ih, w_hh, b_ih, b_hh))
            w_in_layers.append(reorder(w_ih.T))                 # (d_in, 4H)
            w_hh_layers.append(reorder(w_hh.T))                 # (H, 4H)
            b_layers.append(reorder(b_ih + b_hh)[None, :])      # (1, 4H)

        pdt = self.param_dtype
        self.w_in0 = w_in_layers[0].astype(pdt)                  # (D, 4H)
        if L > 1:
            self.w_in = jnp.stack(w_in_layers[1:]).astype(pdt)   # (L-1, H, 4H)
        else:
            self.w_in = jnp.zeros((1, H, 4 * H), pdt)            # unused dummy
        self.w_hh = jnp.stack(w_hh_layers).astype(pdt)           # (L, H, 4H)
        self.bias = jnp.stack(b_layers).astype(jnp.float32)      # (L, 1, 4H)

    def __call__(self, x, *, chunk_override=None):
        if x.ndim == 2:                       # (T, D) -> (1, T, D), like PyTorch
            x = x[None]
        B, T, D = x.shape
        assert D == self.input_dim
        H, L = self.hidden_dim, self.num_layers
        Bp = ((B + 7) // 8) * 8               # pad batch to a sublane multiple

        xbytes = int(np.dtype(self.x_dtype).itemsize)
        pbytes = int(np.dtype(self.param_dtype).itemsize)
        vmem_cap = _vmem_capacity_bytes()

        # Resident (chunk-independent) bytes: single-buffered weights, bias,
        # h/c carries and the output block.
        fixed = (pbytes * (self.w_in0.size + self.w_in.size + self.w_hh.size)
                 + 4 * self.bias.size
                 + 4 * 2 * L * Bp * H
                 + 4 * Bp * H)
        # Per-timestep bytes: double-buffered x rows + gate rows + h-seq rows.
        per_t = Bp * (2 * D * xbytes + 4 * 4 * H + (4 * H if L > 1 else 0))
        budget = int(0.5 * vmem_cap)
        max_chunk = max(1, (budget - fixed) // max(1, per_t))

        chunk = min(T, self._MAX_CHUNK_T, max_chunk)
        if chunk_override is not None:
            chunk = min(int(chunk_override), T)
        if chunk < T:                         # multi-chunk: keep tiles 8-aligned
            chunk = min(T, max(8, (chunk // 8) * 8))
        num_chunks = -(-T // chunk)
        t_pad = num_chunks * chunk
        ragged = (t_pad != T)

        # Unroll bounded by per-step live bytes so the vreg file does not spill.
        step_bytes = 4 * Bp * 8 * H
        unroll = max(1, min(8, chunk, (128 * 1024) // max(1, step_bytes)))

        # Stage x time-major, batch-padded and flattened to 2-D so every
        # in-kernel access is a plain aligned 2-D tile (no in-kernel reshapes).
        xs = x.astype(self.x_dtype)
        xs = jnp.pad(xs, ((0, Bp - B), (0, t_pad - T), (0, 0)))
        x_flat = jnp.transpose(xs, (1, 0, 2)).reshape(t_pad * Bp, D)

        out = _fused_lstm(
            x_flat, self.w_in0, self.w_in, self.w_hh, self.bias,
            seq_len=T, chunk=chunk, batch_p=Bp, in_dim=D, hidden=H,
            num_layers=L, ragged=ragged, unroll=unroll,
            vmem_limit=int(0.8 * vmem_cap))
        return out[:B]


def _lstm_reference(x, raw_params, hidden_dim):
    """Pure-JAX reference mirroring torch.nn.LSTM(batch_first=True) -> hn[-1]."""
    if x.ndim == 2:
        x = x[None]
    B = x.shape[0]
    H = hidden_dim
    seq = jnp.transpose(x.astype(jnp.float32), (1, 0, 2))  # (T, B, D)
    h_last = None
    for (w_ih, w_hh, b_ih, b_hh) in raw_params:
        def step(carry, x_t, w_ih=w_ih, w_hh=w_hh, b_ih=b_ih, b_hh=b_hh):
            h, c = carry
            g = x_t @ w_ih.T + h @ w_hh.T + b_ih + b_hh
            i = jax.nn.sigmoid(g[:, 0 * H:1 * H])
            f = jax.nn.sigmoid(g[:, 1 * H:2 * H])
            gg = jnp.tanh(g[:, 2 * H:3 * H])
            o = jax.nn.sigmoid(g[:, 3 * H:4 * H])
            c = f * c + i * gg
            h = o * jnp.tanh(c)
            return (h, c), h
        init = (jnp.zeros((B, H), jnp.float32), jnp.zeros((B, H), jnp.float32))
        (h_last, _), seq = jax.lax.scan(step, init, seq)
    return h_last


if __name__ == "__main__":
    batch, seq_len, input_dim, hidden_dim, num_layers = 2, 8, 16, 32, 2

    key = jax.random.PRNGKey(0)
    key_params, key_x, key_x2 = jax.random.split(key, 3)

    model = LSTMFeatureExtractorPallas(input_dim, hidden_dim, num_layers,
                                       key_params)

    # Test 1: aligned sequence (single chunk).
    x = jax.random.normal(key_x, (batch, seq_len, input_dim), jnp.float32)
    out = jax.block_until_ready(model(x))
    assert out.shape == (batch, hidden_dim), out.shape
    assert bool(jnp.all(jnp.isfinite(out)))
    ref = jax.block_until_ready(_lstm_reference(x, model.raw_params, hidden_dim))
    err = float(jnp.max(jnp.abs(out - ref)))
    assert jnp.allclose(out, ref, atol=2e-5, rtol=2e-5), err

    # Test 2: multi-chunk grid with a ragged tail — exercises the cross-chunk
    # h/c state carry and the padded-timestep handling.
    t2 = 13
    x2 = jax.random.normal(key_x2, (batch, t2, input_dim), jnp.float32)
    out2 = jax.block_until_ready(model(x2, chunk_override=8))
    ref2 = jax.block_until_ready(_lstm_reference(x2, model.raw_params,
                                                 hidden_dim))
    err2 = float(jnp.max(jnp.abs(out2 - ref2)))
    assert jnp.allclose(out2, ref2, atol=2e-5, rtol=2e-5), err2

    print("KERNEL_OK")
</pallas_src>

<mosaic_0001>
module attributes {stable_mosaic.version = 11 : i64} {
  func.func @_fused_lstm_kernel(%arg0: i32, %arg1: memref<64x16xf32, #tpu.memory_space<vmem>>, %arg2: memref<16x128xf32, #tpu.memory_space<any>>, %arg3: memref<1x32x128xf32, #tpu.memory_space<any>>, %arg4: memref<2x32x128xf32, #tpu.memory_space<any>>, %arg5: memref<2x1x128xf32, #tpu.memory_space<any>>, %arg6: memref<8x32xf32, #tpu.memory_space<vmem>>, %arg7: memref<16x128xf32, #tpu.memory_space<vmem>>, %arg8: memref<1x32x128xf32, #tpu.memory_space<vmem>>, %arg9: memref<2x32x128xf32, #tpu.memory_space<vmem>>, %arg10: memref<2x1x128xf32, #tpu.memory_space<vmem>>, %arg11: memref<64x128xf32, #tpu.memory_space<vmem>>, %arg12: memref<64x32xf32, #tpu.memory_space<vmem>>, %arg13: memref<2x8x32xf32, #tpu.memory_space<vmem>>, %arg14: memref<2x8x32xf32, #tpu.memory_space<vmem>>, %arg15: memref<4x!tpu.dma_semaphore, #tpu.memory_space<semaphore_mem>>) attributes {dimension_semantics = [#tpu.dimension_semantics<arbitrary>], iteration_bounds = array<i64: 1>, scalar_prefetch = 0 : i64, scratch_operands = 9 : i64, tpu.core_type = #tpu.core_type<tc>, window_params = [{transform_indices = @transform_0, window_bounds = array<i64: 64, 16>}, {}, {}, {}, {}, {pipeline_mode = #tpu.pipeline_mode<synchronous>, transform_indices = @transform_5, window_bounds = array<i64: 8, 32>}]} {
    %c0_i32 = arith.constant 0 : i32
    %0 = arith.cmpi eq, %arg0, %c0_i32 : i32
    %1 = arith.extui %0 : i1 to i32
    %c0_i32_0 = arith.constant 0 : i32
    %2 = arith.cmpi ne, %1, %c0_i32_0 : i32
    scf.if %2 {
      %c0_i32_175 = arith.constant 0 : i32
      %441 = tpu.memref_slice %arg15[%c0_i32_175] : memref<4x!tpu.dma_semaphore, #tpu.memory_space<semaphore_mem>> -> memref<1x!tpu.dma_semaphore, #tpu.memory_space<semaphore_mem>>
      %442 = tpu.memref_squeeze %441 : memref<1x!tpu.dma_semaphore, #tpu.memory_space<semaphore_mem>> -> memref<!tpu.dma_semaphore, #tpu.memory_space<semaphore_mem>>
      tpu.enqueue_dma source(%arg2 : memref<16x128xf32, #tpu.memory_space<any>>) target(%arg7 : memref<16x128xf32, #tpu.memory_space<vmem>>) target_semaphore(%442 : memref<!tpu.dma_semaphore, #tpu.memory_space<semaphore_mem>>)
      %c1_i32_176 = arith.constant 1 : i32
      %443 = tpu.memref_slice %arg15[%c1_i32_176] : memref<4x!tpu.dma_semaphore, #tpu.memory_space<semaphore_mem>> -> memref<1x!tpu.dma_semaphore, #tpu.memory_space<semaphore_mem>>
      %444 = tpu.memref_squeeze %443 : memref<1x!tpu.dma_semaphore, #tpu.memory_space<semaphore_mem>> -> memref<!tpu.dma_semaphore, #tpu.memory_space<semaphore_mem>>
      tpu.enqueue_dma source(%arg3 : memref<1x32x128xf32, #tpu.memory_space<any>>) target(%arg8 : memref<1x32x128xf32, #tpu.memory_space<vmem>>) target_semaphore(%444 : memref<!tpu.dma_semaphore, #tpu.memory_space<semaphore_mem>>)
      %c2_i32_177 = arith.constant 2 : i32
      %445 = tpu.memref_slice %arg15[%c2_i32_177] : memref<4x!tpu.dma_semaphore, #tpu.memory_space<semaphore_mem>> -> memref<1x!tpu.dma_semaphore, #tpu.memory_space<semaphore_mem>>
      %446 = tpu.memref_squeeze %445 : memref<1x!tpu.dma_semaphore, #tpu.memory_space<semaphore_mem>> -> memref<!tpu.dma_semaphore, #tpu.memory_space<semaphore_mem>>
      tpu.enqueue_dma source(%arg4 : memref<2x32x128xf32, #tpu.memory_space<any>>) target(%arg9 : memref<2x32x128xf32, #tpu.memory_space<vmem>>) target_semaphore(%446 : memref<!tpu.dma_semaphore, #tpu.memory_space<semaphore_mem>>)
      %c3_i32_178 = arith.constant 3 : i32
      %447 = tpu.memref_slice %arg15[%c3_i32_178] : memref<4x!tpu.dma_semaphore, #tpu.memory_space<semaphore_mem>> -> memref<1x!tpu.dma_semaphore, #tpu.memory_space<semaphore_mem>>
      %448 = tpu.memref_squeeze %447 : memref<1x!tpu.dma_semaphore, #tpu.memory_space<semaphore_mem>> -> memref<!tpu.dma_semaphore, #tpu.memory_space<semaphore_mem>>
      tpu.enqueue_dma source(%arg5 : memref<2x1x128xf32, #tpu.memory_space<any>>) target(%arg10 : memref<2x1x128xf32, #tpu.memory_space<vmem>>) target_semaphore(%448 : memref<!tpu.dma_semaphore, #tpu.memory_space<semaphore_mem>>)
      %c0_i32_179 = arith.constant 0 : i32
      %449 = tpu.memref_slice %arg15[%c0_i32_179] : memref<4x!tpu.dma_semaphore, #tpu.memory_space<semaphore_mem>> -> memref<1x!tpu.dma_semaphore, #tpu.memory_space<semaphore_mem>>
      %450 = tpu.memref_squeeze %449 : memref<1x!tpu.dma_semaphore, #tpu.memory_space<semaphore_mem>> -> memref<!tpu.dma_semaphore, #tpu.memory_space<semaphore_mem>>
      tpu.wait_dma2 semaphore(%450 : memref<!tpu.dma_semaphore, #tpu.memory_space<semaphore_mem>>) src(%arg2 : memref<16x128xf32, #tpu.memory_space<any>>) dst(%arg7 : memref<16x128xf32, #tpu.memory_space<vmem>>)
      %c1_i32_180 = arith.constant 1 : i32
      %451 = tpu.memref_slice %arg15[%c1_i32_180] : memref<4x!tpu.dma_semaphore, #tpu.memory_space<semaphore_mem>> -> memref<1x!tpu.dma_semaphore, #tpu.memory_space<semaphore_mem>>
      %452 = tpu.memref_squeeze %451 : memref<1x!tpu.dma_semaphore, #tpu.memory_space<semaphore_mem>> -> memref<!tpu.dma_semaphore, #tpu.memory_space<semaphore_mem>>
      tpu.wait_dma2 semaphore(%452 : memref<!tpu.dma_semaphore, #tpu.memory_space<semaphore_mem>>) src(%arg3 : memref<1x32x128xf32, #tpu.memory_space<any>>) dst(%arg8 : memref<1x32x128xf32, #tpu.memory_space<vmem>>)
      %c2_i32_181 = arith.constant 2 : i32
      %453 = tpu.memref_slice %arg15[%c2_i32_181] : memref<4x!tpu.dma_semaphore, #tpu.memory_space<semaphore_mem>> -> memref<1x!tpu.dma_semaphore, #tpu.memory_space<semaphore_mem>>
      %454 = tpu.memref_squeeze %453 : memref<1x!tpu.dma_semaphore, #tpu.memory_space<semaphore_mem>> -> memref<!tpu.dma_semaphore, #tpu.memory_space<semaphore_mem>>
      tpu.wait_dma2 semaphore(%454 : memref<!tpu.dma_semaphore, #tpu.memory_space<semaphore_mem>>) src(%arg4 : memref<2x32x128xf32, #tpu.memory_space<any>>) dst(%arg9 : memref<2x32x128xf32, #tpu.memory_space<vmem>>)
      %c3_i32_182 = arith.constant 3 : i32
      %455 = tpu.memref_slice %arg15[%c3_i32_182] : memref<4x!tpu.dma_semaphore, #tpu.memory_space<semaphore_mem>> -> memref<1x!tpu.dma_semaphore, #tpu.memory_space<semaphore_mem>>
      %456 = tpu.memref_squeeze %455 : memref<1x!tpu.dma_semaphore, #tpu.memory_space<semaphore_mem>> -> memref<!tpu.dma_semaphore, #tpu.memory_space<semaphore_mem>>
      tpu.wait_dma2 semaphore(%456 : memref<!tpu.dma_semaphore, #tpu.memory_space<semaphore_mem>>) src(%arg5 : memref<2x1x128xf32, #tpu.memory_space<any>>) dst(%arg10 : memref<2x1x128xf32, #tpu.memory_space<vmem>>)
      %cst_183 = arith.constant 0.000000e+00 : f32
      %457 = vector.broadcast %cst_183 : f32 to vector<2x8x32xf32>
      %c0_184 = arith.constant 0 : index
      %c0_185 = arith.constant 0 : index
      %c0_186 = arith.constant 0 : index
      %458 = vector.load %arg13[%c0_184, %c0_185, %c0_186] : memref<2x8x32xf32, #tpu.memory_space<vmem>>, vector<2x8x32xf32>
      tpu.vector_store %arg13[%c0_184, %c0_185, %c0_186], %457 {strides = array<i32>} : memref<2x8x32xf32, #tpu.memory_space<vmem>>, vector<2x8x32xf32>,
      %cst_187 = arith.constant 0.000000e+00 : f32
      %459 = vector.broadcast %cst_187 : f32 to vector<2x8x32xf32>
      %c0_188 = arith.constant 0 : index
      %c0_189 = arith.constant 0 : index
      %c0_190 = arith.constant 0 : index
      %460 = vector.load %arg14[%c0_188, %c0_189, %c0_190] : memref<2x8x32xf32, #tpu.memory_space<vmem>>, vector<2x8x32xf32>
      tpu.vector_store %arg14[%c0_188, %c0_189, %c0_190], %459 {strides = array<i32>} : memref<2x8x32xf32, #tpu.memory_space<vmem>>, vector<2x8x32xf32>,
    } else {
    }
    %c0 = arith.constant 0 : index
    %c0_1 = arith.constant 0 : index
    %3 = vector.load %arg1[%c0, %c0_1] : memref<64x16xf32, #tpu.memory_space<vmem>>, vector<64x16xf32>
    %c0_2 = arith.constant 0 : index
    %c0_3 = arith.constant 0 : index
    %4 = vector.load %arg7[%c0_2, %c0_3] : memref<16x128xf32, #tpu.memory_space<vmem>>, vector<16x128xf32>
    %cst = arith.constant dense<0.000000e+00> : vector<64x128xf32>
    %5 = tpu.matmul %3, %4, %cst {dimension_numbers = #tpu.dot_dimension_numbers<[1], [0], [0], [1], [0, 0, 1, 1], [], []>} : vector<64x16xf32>, vector<16x128xf32>, vector<64x128xf32> -> vector<64x128xf32>
    %c0_4 = arith.constant 0 : index
    %c0_5 = arith.constant 0 : index
    %c0_6 = arith.constant 0 : index
    %6 = vector.load %arg10[%c0_4, %c0_5, %c0_6] : memref<2x1x128xf32, #tpu.memory_space<vmem>>, vector<1x1x128xf32>
    %7 = vector.shape_cast %6 : vector<1x1x128xf32> to vector<1x128xf32>
    %8 = vector.broadcast %7 : vector<1x128xf32> to vector<64x128xf32>
    %9 = arith.addf %5, %8 : vector<64x128xf32>
    %c0_7 = arith.constant 0 : index
    %c0_8 = arith.constant 0 : index
    %10 = vector.load %arg11[%c0_7, %c0_8] : memref<64x128xf32, #tpu.memory_space<vmem>>, vector<64x128xf32>
    tpu.vector_store %arg11[%c0_7, %c0_8], %9 {strides = array<i32>} : memref<64x128xf32, #tpu.memory_space<vmem>>, vector<64x128xf32>,
    %c0_9 = arith.constant 0 : index
    %c0_10 = arith.constant 0 : index
    %c0_11 = arith.constant 0 : index
    %11 = vector.load %arg13[%c0_9, %c0_10, %c0_11] : memref<2x8x32xf32, #tpu.memory_space<vmem>>, vector<1x8x32xf32>
    %12 = vector.shape_cast %11 : vector<1x8x32xf32> to vector<8x32xf32>
    %c0_12 = arith.constant 0 : index
    %c0_13 = arith.constant 0 : index
    %c0_14 = arith.constant 0 : index
    %13 = vector.load %arg14[%c0_12, %c0_13, %c0_14] : memref<2x8x32xf32, #tpu.memory_space<vmem>>, vector<1x8x32xf32>
    %14 = vector.shape_cast %13 : vector<1x8x32xf32> to vector<8x32xf32>
    %c0_i32_15 = arith.constant 0 : i32
    %c8_i32 = arith.constant 8 : i32
    %15 = arith.muli %c0_i32_15, %c8_i32 : i32
    %16 = tpu.assume_multiple %15, 8 : i32
    %17 = arith.index_cast %16 : i32 to index
    %c0_16 = arith.constant 0 : index
    %18 = vector.load %arg11[%17, %c0_16] : memref<64x128xf32, #tpu.memory_space<vmem>>, vector<8x128xf32>
    %c0_17 = arith.constant 0 : index
    %c0_18 = arith.constant 0 : index
    %c0_19 = arith.constant 0 : index
    %19 = vector.load %arg9[%c0_17, %c0_18, %c0_19] : memref<2x32x128xf32, #tpu.memory_space<vmem>>, vector<1x32x128xf32>
    %20 = vector.shape_cast %19 : vector<1x32x128xf32> to vector<32x128xf32>
    %cst_20 = arith.constant dense<0.000000e+00> : vector<8x128xf32>
    %21 = tpu.matmul %12, %20, %cst_20 {dimension_numbers = #tpu.dot_dimension_numbers<[1], [0], [0], [1], [0, 0, 1, 1], [], []>} : vector<8x32xf32>, vector<32x128xf32>, vector<8x128xf32> -> vector<8x128xf32>
    %22 = arith.addf %18, %21 : vector<8x128xf32>
    %23 = vector.extract_strided_slice %22 {offsets = [0, 0], sizes = [8, 96], strides = [1, 1]} : vector<8x128xf32> to vector<8x96xf32>
    %24 = arith.negf %23 : vector<8x96xf32>
    %25 = math.exp %24 : vector<8x96xf32>
    %cst_21 = arith.constant 1.000000e+00 : f32
    %26 = vector.broadcast %cst_21 : f32 to vector<8x96xf32>
    %27 = arith.addf %26, %25 : vector<8x96xf32>
    %28 = arith.divf %26, %27 : vector<8x96xf32>
    %29 = vector.extract_strided_slice %22 {offsets = [0, 96], sizes = [8, 32], strides = [1, 1]} : vector<8x128xf32> to vector<8x32xf32>
    %30 = math.tanh %29 : vector<8x32xf32>
    %31 = vector.extract_strided_slice %28 {offsets = [0, 0], sizes = [8, 32], strides = [1, 1]} : vector<8x96xf32> to vector<8x32xf32>
    %32 = vector.extract_strided_slice %28 {offsets = [0, 32], sizes = [8, 32], strides = [1, 1]} : vector<8x96xf32> to vector<8x32xf32>
    %33 = vector.extract_strided_slice %28 {offsets = [0, 64], sizes = [8, 32], strides = [1, 1]} : vector<8x96xf32> to vector<8x32xf32>
    %34 = arith.mulf %32, %14 : vector<8x32xf32>
    %35 = arith.mulf %31, %30 : vector<8x32xf32>
    %36 = arith.addf %34, %35 : vector<8x32xf32>
    %37 = math.tanh %36 : vector<8x32xf32>
    %38 = arith.mulf %33, %37 : vector<8x32xf32>
    %39 = arith.index_cast %16 : i32 to index
    %c0_22 = arith.constant 0 : index
    %40 = vector.load %arg12[%39, %c0_22] : memref<64x32xf32, #tpu.memory_space<vmem>>, vector<8x32xf32>
    tpu.vector_store %arg12[%39, %c0_22], %38 {strides = array<i32>} : memref<64x32xf32, #tpu.memory_space<vmem>>, vector<8x32xf32>,
    %c1_i32 = arith.constant 1 : i32
    %c8_i32_23 = arith.constant 8 : i32
    %41 = arith.muli %c1_i32, %c8_i32_23 : i32
    %42 = tpu.assume_multiple %41, 8 : i32
    %43 = arith.index_cast %42 : i32 to index
    %c0_24 = arith.constant 0 : index
    %44 = vector.load %arg11[%43, %c0_24] : memref<64x128xf32, #tpu.memory_space<vmem>>, vector<8x128xf32>
    %c0_25 = arith.constant 0 : index
    %c0_26 = arith.constant 0 : index
    %c0_27 = arith.constant 0 : index
    %45 = vector.load %arg9[%c0_25, %c0_26, %c0_27] : memref<2x32x128xf32, #tpu.memory_space<vmem>>, vector<1x32x128xf32>
    %46 = vector.shape_cast %45 : vector<1x32x128xf32> to vector<32x128xf32>
    %cst_28 = arith.constant dense<0.000000e+00> : vector<8x128xf32>
    %47 = tpu.matmul %38, %46, %cst_28 {dimension_numbers = #tpu.dot_dimension_numbers<[1], [0], [0], [1], [0, 0, 1, 1], [], []>} : vector<8x32xf32>, vector<32x128xf32>, vector<8x128xf32> -> vector<8x128xf32>
    %48 = arith.addf %44, %47 : vector<8x128xf32>
    %49 = vector.extract_strided_slice %48 {offsets = [0, 0], sizes = [8, 96], strides = [1, 1]} : vector<8x128xf32> to vector<8x96xf32>
    %50 = arith.negf %49 : vector<8x96xf32>
    %51 = math.exp %50 : vector<8x96xf32>
    %cst_29 = arith.constant 1.000000e+00 : f32
    %52 = vector.broadcast %cst_29 : f32 to vector<8x96xf32>
    %53 = arith.addf %52, %51 : vector<8x96xf32>
    %54 = arith.divf %52, %53 : vector<8x96xf32>
    %55 = vector.extract_strided_slice %48 {offsets = [0, 96], sizes = [8, 32], strides = [1, 1]} : vector<8x128xf32> to vector<8x32xf32>
    %56 = math.tanh %55 : vector<8x32xf32>
    %57 = vector.extract_strided_slice %54 {offsets = [0, 0], sizes = [8, 32], strides = [1, 1]} : vector<8x96xf32> to vector<8x32xf32>
    %58 = vector.extract_strided_slice %54 {offsets = [0, 32], sizes = [8, 32], strides = [1, 1]} : vector<8x96xf32> to vector<8x32xf32>
    %59 = vector.extract_strided_slice %54 {offsets = [0, 64], sizes = [8, 32], strides = [1, 1]} : vector<8x96xf32> to vector<8x32xf32>
    %60 = arith.mulf %58, %36 : vector<8x32xf32>
    %61 = arith.mulf %57, %56 : vector<8x32xf32>
    %62 = arith.addf %60, %61 : vector<8x32xf32>
    %63 = math.tanh %62 : vector<8x32xf32>
    %64 = arith.mulf %59, %63 : vector<8x32xf32>
    %65 = arith.index_cast %42 : i32 to index
    %c0_30 = arith.constant 0 : index
    %66 = vector.load %arg12[%65, %c0_30] : memref<64x32xf32, #tpu.memory_space<vmem>>, vector<8x32xf32>
    tpu.vector_store %arg12[%65, %c0_30], %64 {strides = array<i32>} : memref<64x32xf32, #tpu.memory_space<vmem>>, vector<8x32xf32>,
    %c2_i32 = arith.constant 2 : i32
    %c8_i32_31 = arith.constant 8 : i32
    %67 = arith.muli %c2_i32, %c8_i32_31 : i32
    %68 = tpu.assume_multiple %67, 8 : i32
    %69 = arith.index_cast %68 : i32 to index
    %c0_32 = arith.constant 0 : index
    %70 = vector.load %arg11[%69, %c0_32] : memref<64x128xf32, #tpu.memory_space<vmem>>, vector<8x128xf32>
    %c0_33 = arith.constant 0 : index
    %c0_34 = arith.constant 0 : index
    %c0_35 = arith.constant 0 : index
    %71 = vector.load %arg9[%c0_33, %c0_34, %c0_35] : memref<2x32x128xf32, #tpu.memory_space<vmem>>, vector<1x32x128xf32>
    %72 = vector.shape_cast %71 : vector<1x32x128xf32> to vector<32x128xf32>
    %cst_36 = arith.constant dense<0.000000e+00> : vector<8x128xf32>
    %73 = tpu.matmul %64, %72, %cst_36 {dimension_numbers = #tpu.dot_dimension_numbers<[1], [0], [0], [1], [0, 0, 1, 1], [], []>} : vector<8x32xf32>, vector<32x128xf32>, vector<8x128xf32> -> vector<8x128xf32>
    %74 = arith.addf %70, %73 : vector<8x128xf32>
    %75 = vector.extract_strided_slice %74 {offsets = [0, 0], sizes = [8, 96], strides = [1, 1]} : vector<8x128xf32> to vector<8x96xf32>
    %76 = arith.negf %75 : vector<8x96xf32>
    %77 = math.exp %76 : vector<8x96xf32>
    %cst_37 = arith.constant 1.000000e+00 : f32
    %78 = vector.broadcast %cst_37 : f32 to vector<8x96xf32>
    %79 = arith.addf %78, %77 : vector<8x96xf32>
    %80 = arith.divf %78, %79 : vector<8x96xf32>
    %81 = vector.extract_strided_slice %74 {offsets = [0, 96], sizes = [8, 32], strides = [1, 1]} : vector<8x128xf32> to vector<8x32xf32>
    %82 = math.tanh %81 : vector<8x32xf32>
    %83 = vector.extract_strided_slice %80 {offsets = [0, 0], sizes = [8, 32], strides = [1, 1]} : vector<8x96xf32> to vector<8x32xf32>
    %84 = vector.extract_strided_slice %80 {offsets = [0, 32], sizes = [8, 32], strides = [1, 1]} : vector<8x96xf32> to vector<8x32xf32>
    %85 = vector.extract_strided_slice %80 {offsets = [0, 64], sizes = [8, 32], strides = [1, 1]} : vector<8x96xf32> to vector<8x32xf32>
    %86 = arith.mulf %84, %62 : vector<8x32xf32>
    %87 = arith.mulf %83, %82 : vector<8x32xf32>
    %88 = arith.addf %86, %87 : vector<8x32xf32>
    %89 = math.tanh %88 : vector<8x32xf32>
    %90 = arith.mulf %85, %89 : vector<8x32xf32>
    %91 = arith.index_cast %68 : i32 to index
    %c0_38 = arith.constant 0 : index
    %92 = vector.load %arg12[%91, %c0_38] : memref<64x32xf32, #tpu.memory_space<vmem>>, vector<8x32xf32>
    tpu.vector_store %arg12[%91, %c0_38], %90 {strides = array<i32>} : memref<64x32xf32, #tpu.memory_space<vmem>>, vector<8x32xf32>,
    %c3_i32 = arith.constant 3 : i32
    %c8_i32_39 = arith.constant 8 : i32
    %93 = arith.muli %c3_i32, %c8_i32_39 : i32
    %94 = tpu.assume_multiple %93, 8 : i32
    %95 = arith.index_cast %94 : i32 to index
    %c0_40 = arith.constant 0 : index
    %96 = vector.load %arg11[%95, %c0_40] : memref<64x128xf32, #tpu.memory_space<vmem>>, vector<8x128xf32>
    %c0_41 = arith.constant 0 : index
    %c0_42 = arith.constant 0 : index
    %c0_43 = arith.constant 0 : index
    %97 = vector.load %arg9[%c0_41, %c0_42, %c0_43] : memref<2x32x128xf32, #tpu.memory_space<vmem>>, vector<1x32x128xf32>
    %98 = vector.shape_cast %97 : vector<1x32x128xf32> to vector<32x128xf32>
    %cst_44 = arith.constant dense<0.000000e+00> : vector<8x128xf32>
    %99 = tpu.matmul %90, %98, %cst_44 {dimension_numbers = #tpu.dot_dimension_numbers<[1], [0], [0], [1], [0, 0, 1, 1], [], []>} : vector<8x32xf32>, vector<32x128xf32>, vector<8x128xf32> -> vector<8x128xf32>
    %100 = arith.addf %96, %99 : vector<8x128xf32>
    %101 = vector.extract_strided_slice %100 {offsets = [0, 0], sizes = [8, 96], strides = [1, 1]} : vector<8x128xf32> to vector<8x96xf32>
    %102 = arith.negf %101 : vector<8x96xf32>
    %103 = math.exp %102 : vector<8x96xf32>
    %cst_45 = arith.constant 1.000000e+00 : f32
    %104 = vector.broadcast %cst_45 : f32 to vector<8x96xf32>
    %105 = arith.addf %104, %103 : vector<8x96xf32>
    %106 = arith.divf %104, %105 : vector<8x96xf32>
    %107 = vector.extract_strided_slice %100 {offsets = [0, 96], sizes = [8, 32], strides = [1, 1]} : vector<8x128xf32> to vector<8x32xf32>
    %108 = math.tanh %107 : vector<8x32xf32>
    %109 = vector.extract_strided_slice %106 {offsets = [0, 0], sizes = [8, 32], strides = [1, 1]} : vector<8x96xf32> to vector<8x32xf32>
    %110 = vector.extract_strided_slice %106 {offsets = [0, 32], sizes = [8, 32], strides = [1, 1]} : vector<8x96xf32> to vector<8x32xf32>
    %111 = vector.extract_strided_slice %106 {offsets = [0, 64], sizes = [8, 32], strides = [1, 1]} : vector<8x96xf32> to vector<8x32xf32>
    %112 = arith.mulf %110, %88 : vector<8x32xf32>
    %113 = arith.mulf %109, %108 : vector<8x32xf32>
    %114 = arith.addf %112, %113 : vector<8x32xf32>
    %115 = math.tanh %114 : vector<8x32xf32>
    %116 = arith.mulf %111, %115 : vector<8x32xf32>
    %117 = arith.index_cast %94 : i32 to index
    %c0_46 = arith.constant 0 : index
    %118 = vector.load %arg12[%117, %c0_46] : memref<64x32xf32, #tpu.memory_space<vmem>>, vector<8x32xf32>
    tpu.vector_store %arg12[%117, %c0_46], %116 {strides = array<i32>} : memref<64x32xf32, #tpu.memory_space<vmem>>, vector<8x32xf32>,
    %c4_i32 = arith.constant 4 : i32
    %c8_i32_47 = arith.constant 8 : i32
    %119 = arith.muli %c4_i32, %c8_i32_47 : i32
    %120 = tpu.assume_multiple %119, 8 : i32
    %121 = arith.index_cast %120 : i32 to index
    %c0_48 = arith.constant 0 : index
    %122 = vector.load %arg11[%121, %c0_48] : memref<64x128xf32, #tpu.memory_space<vmem>>, vector<8x128xf32>
    %c0_49 = arith.constant 0 : index
    %c0_50 = arith.constant 0 : index
    %c0_51 = arith.constant 0 : index
    %123 = vector.load %arg9[%c0_49, %c0_50, %c0_51] : memref<2x32x128xf32, #tpu.memory_space<vmem>>, vector<1x32x128xf32>
    %124 = vector.shape_cast %123 : vector<1x32x128xf32> to vector<32x128xf32>
    %cst_52 = arith.constant dense<0.000000e+00> : vector<8x128xf32>
    %125 = tpu.matmul %116, %124, %cst_52 {dimension_numbers = #tpu.dot_dimension_numbers<[1], [0], [0], [1], [0, 0, 1, 1], [], []>} : vector<8x32xf32>, vector<32x128xf32>, vector<8x128xf32> -> vector<8x128xf32>
    %126 = arith.addf %122, %125 : vector<8x128xf32>
    %127 = vector.extract_strided_slice %126 {offsets = [0, 0], sizes = [8, 96], strides = [1, 1]} : vector<8x128xf32> to vector<8x96xf32>
    %128 = arith.negf %127 : vector<8x96xf32>
    %129 = math.exp %128 : vector<8x96xf32>
    %cst_53 = arith.constant 1.000000e+00 : f32
    %130 = vector.broadcast %cst_53 : f32 to vector<8x96xf32>
    %131 = arith.addf %130, %129 : vector<8x96xf32>
    %132 = arith.divf %130, %131 : vector<8x96xf32>
    %133 = vector.extract_strided_slice %126 {offsets = [0, 96], sizes = [8, 32], strides = [1, 1]} : vector<8x128xf32> to vector<8x32xf32>
    %134 = math.tanh %133 : vector<8x32xf32>
    %135 = vector.extract_strided_slice %132 {offsets = [0, 0], sizes = [8, 32], strides = [1, 1]} : vector<8x96xf32> to vector<8x32xf32>
    %136 = vector.extract_strided_slice %132 {offsets = [0, 32], sizes = [8, 32], strides = [1, 1]} : vector<8x96xf32> to vector<8x32xf32>
    %137 = vector.extract_strided_slice %132 {offsets = [0, 64], sizes = [8, 32], strides = [1, 1]} : vector<8x96xf32> to vector<8x32xf32>
    %138 = arith.mulf %136, %114 : vector<8x32xf32>
    %139 = arith.mulf %135, %134 : vector<8x32xf32>
    %140 = arith.addf %138, %139 : vector<8x32xf32>
    %141 = math.tanh %140 : vector<8x32xf32>
    %142 = arith.mulf %137, %141 : vector<8x32xf32>
    %143 = arith.index_cast %120 : i32 to index
    %c0_54 = arith.constant 0 : index
    %144 = vector.load %arg12[%143, %c0_54] : memref<64x32xf32, #tpu.memory_space<vmem>>, vector<8x32xf32>
    tpu.vector_store %arg12[%143, %c0_54], %142 {strides = array<i32>} : memref<64x32xf32, #tpu.memory_space<vmem>>, vector<8x32xf32>,
    %c5_i32 = arith.constant 5 : i32
    %c8_i32_55 = arith.constant 8 : i32
    %145 = arith.muli %c5_i32, %c8_i32_55 : i32
    %146 = tpu.assume_multiple %145, 8 : i32
    %147 = arith.index_cast %146 : i32 to index
    %c0_56 = arith.constant 0 : index
    %148 = vector.load %arg11[%147, %c0_56] : memref<64x128xf32, #tpu.memory_space<vmem>>, vector<8x128xf32>
    %c0_57 = arith.constant 0 : index
    %c0_58 = arith.constant 0 : index
    %c0_59 = arith.constant 0 : index
    %149 = vector.load %arg9[%c0_57, %c0_58, %c0_59] : memref<2x32x128xf32, #tpu.memory_space<vmem>>, vector<1x32x128xf32>
    %150 = vector.shape_cast %149 : vector<1x32x128xf32> to vector<32x128xf32>
    %cst_60 = arith.constant dense<0.000000e+00> : vector<8x128xf32>
    %151 = tpu.matmul %142, %150, %cst_60 {dimension_numbers = #tpu.dot_dimension_numbers<[1], [0], [0], [1], [0, 0, 1, 1], [], []>} : vector<8x32xf32>, vector<32x128xf32>, vector<8x128xf32> -> vector<8x128xf32>
    %152 = arith.addf %148, %151 : vector<8x128xf32>
    %153 = vector.extract_strided_slice %152 {offsets = [0, 0], sizes = [8, 96], strides = [1, 1]} : vector<8x128xf32> to vector<8x96xf32>
    %154 = arith.negf %153 : vector<8x96xf32>
    %155 = math.exp %154 : vector<8x96xf32>
    %cst_61 = arith.constant 1.000000e+00 : f32
    %156 = vector.broadcast %cst_61 : f32 to vector<8x96xf32>
    %157 = arith.addf %156, %155 : vector<8x96xf32>
    %158 = arith.divf %156, %157 : vector<8x96xf32>
    %159 = vector.extract_strided_slice %152 {offsets = [0, 96], sizes = [8, 32], strides = [1, 1]} : vector<8x128xf32> to vector<8x32xf32>
    %160 = math.tanh %159 : vector<8x32xf32>
    %161 = vector.extract_strided_slice %158 {offsets = [0, 0], sizes = [8, 32], strides = [1, 1]} : vector<8x96xf32> to vector<8x32xf32>
    %162 = vector.extract_strided_slice %158 {offsets = [0, 32], sizes = [8, 32], strides = [1, 1]} : vector<8x96xf32> to vector<8x32xf32>
    %163 = vector.extract_strided_slice %158 {offsets = [0, 64], sizes = [8, 32], strides = [1, 1]} : vector<8x96xf32> to vector<8x32xf32>
    %164 = arith.mulf %162, %140 : vector<8x32xf32>
    %165 = arith.mulf %161, %160 : vector<8x32xf32>
    %166 = arith.addf %164, %165 : vector<8x32xf32>
    %167 = math.tanh %166 : vector<8x32xf32>
    %168 = arith.mulf %163, %167 : vector<8x32xf32>
    %169 = arith.index_cast %146 : i32 to index
    %c0_62 = arith.constant 0 : index
    %170 = vector.load %arg12[%169, %c0_62] : memref<64x32xf32, #tpu.memory_space<vmem>>, vector<8x32xf32>
    tpu.vector_store %arg12[%169, %c0_62], %168 {strides = array<i32>} : memref<64x32xf32, #tpu.memory_space<vmem>>, vector<8x32xf32>,
    %c6_i32 = arith.constant 6 : i32
    %c8_i32_63 = arith.constant 8 : i32
    %171 = arith.muli %c6_i32, %c8_i32_63 : i32
    %172 = tpu.assume_multiple %171, 8 : i32
    %173 = arith.index_cast %172 : i32 to index
    %c0_64 = arith.constant 0 : index
    %174 = vector.load %arg11[%173, %c0_64] : memref<64x128xf32, #tpu.memory_space<vmem>>, vector<8x128xf32>
    %c0_65 = arith.constant 0 : index
    %c0_66 = arith.constant 0 : index
    %c0_67 = arith.constant 0 : index
    %175 = vector.load %arg9[%c0_65, %c0_66, %c0_67] : memref<2x32x128xf32, #tpu.memory_space<vmem>>, vector<1x32x128xf32>
    %176 = vector.shape_cast %175 : vector<1x32x128xf32> to vector<32x128xf32>
    %cst_68 = arith.constant dense<0.000000e+00> : vector<8x128xf32>
    %177 = tpu.matmul %168, %176, %cst_68 {dimension_numbers = #tpu.dot_dimension_numbers<[1], [0], [0], [1], [0, 0, 1, 1], [], []>} : vector<8x32xf32>, vector<32x128xf32>, vector<8x128xf32> -> vector<8x128xf32>
    %178 = arith.addf %174, %177 : vector<8x128xf32>
    %179 = vector.extract_strided_slice %178 {offsets = [0, 0], sizes = [8, 96], strides = [1, 1]} : vector<8x128xf32> to vector<8x96xf32>
    %180 = arith.negf %179 : vector<8x96xf32>
    %181 = math.exp %180 : vector<8x96xf32>
    %cst_69 = arith.constant 1.000000e+00 : f32
    %182 = vector.broadcast %cst_69 : f32 to vector<8x96xf32>
    %183 = arith.addf %182, %181 : vector<8x96xf32>
    %184 = arith.divf %182, %183 : vector<8x96xf32>
    %185 = vector.extract_strided_slice %178 {offsets = [0, 96], sizes = [8, 32], strides = [1, 1]} : vector<8x128xf32> to vector<8x32xf32>
    %186 = math.tanh %185 : vector<8x32xf32>
    %187 = vector.extract_strided_slice %184 {offsets = [0, 0], sizes = [8, 32], strides = [1, 1]} : vector<8x96xf32> to vector<8x32xf32>
    %188 = vector.extract_strided_slice %184 {offsets = [0, 32], sizes = [8, 32], strides = [1, 1]} : vector<8x96xf32> to vector<8x32xf32>
    %189 = vector.extract_strided_slice %184 {offsets = [0, 64], sizes = [8, 32], strides = [1, 1]} : vector<8x96xf32> to vector<8x32xf32>
    %190 = arith.mulf %188, %166 : vector<8x32xf32>
    %191 = arith.mulf %187, %186 : vector<8x32xf32>
    %192 = arith.addf %190, %191 : vector<8x32xf32>
    %193 = math.tanh %192 : vector<8x32xf32>
    %194 = arith.mulf %189, %193 : vector<8x32xf32>
    %195 = arith.index_cast %172 : i32 to index
    %c0_70 = arith.constant 0 : index
    %196 = vector.load %arg12[%195, %c0_70] : memref<64x32xf32, #tpu.memory_space<vmem>>, vector<8x32xf32>
    tpu.vector_store %arg12[%195, %c0_70], %194 {strides = array<i32>} : memref<64x32xf32, #tpu.memory_space<vmem>>, vector<8x32xf32>,
    %c7_i32 = arith.constant 7 : i32
    %c8_i32_71 = arith.constant 8 : i32
    %197 = arith.muli %c7_i32, %c8_i32_71 : i32
    %198 = tpu.assume_multiple %197, 8 : i32
    %199 = arith.index_cast %198 : i32 to index
    %c0_72 = arith.constant 0 : index
    %200 = vector.load %arg11[%199, %c0_72] : memref<64x128xf32, #tpu.memory_space<vmem>>, vector<8x128xf32>
    %c0_73 = arith.constant 0 : index
    %c0_74 = arith.constant 0 : index
    %c0_75 = arith.constant 0 : index
    %201 = vector.load %arg9[%c0_73, %c0_74, %c0_75] : memref<2x32x128xf32, #tpu.memory_space<vmem>>, vector<1x32x128xf32>
    %202 = vector.shape_cast %201 : vector<1x32x128xf32> to vector<32x128xf32>
    %cst_76 = arith.constant dense<0.000000e+00> : vector<8x128xf32>
    %203 = tpu.matmul %194, %202, %cst_76 {dimension_numbers = #tpu.dot_dimension_numbers<[1], [0], [0], [1], [0, 0, 1, 1], [], []>} : vector<8x32xf32>, vector<32x128xf32>, vector<8x128xf32> -> vector<8x128xf32>
    %204 = arith.addf %200, %203 : vector<8x128xf32>
    %205 = vector.extract_strided_slice %204 {offsets = [0, 0], sizes = [8, 96], strides = [1, 1]} : vector<8x128xf32> to vector<8x96xf32>
    %206 = arith.negf %205 : vector<8x96xf32>
    %207 = math.exp %206 : vector<8x96xf32>
    %cst_77 = arith.constant 1.000000e+00 : f32
    %208 = vector.broadcast %cst_77 : f32 to vector<8x96xf32>
    %209 = arith.addf %208, %207 : vector<8x96xf32>
    %210 = arith.divf %208, %209 : vector<8x96xf32>
    %211 = vector.extract_strided_slice %204 {offsets = [0, 96], sizes = [8, 32], strides = [1, 1]} : vector<8x128xf32> to vector<8x32xf32>
    %212 = math.tanh %211 : vector<8x32xf32>
    %213 = vector.extract_strided_slice %210 {offsets = [0, 0], sizes = [8, 32], strides = [1, 1]} : vector<8x96xf32> to vector<8x32xf32>
    %214 = vector.extract_strided_slice %210 {offsets = [0, 32], sizes = [8, 32], strides = [1, 1]} : vector<8x96xf32> to vector<8x32xf32>
    %215 = vector.extract_strided_slice %210 {offsets = [0, 64], sizes = [8, 32], strides = [1, 1]} : vector<8x96xf32> to vector<8x32xf32>
    %216 = arith.mulf %214, %192 : vector<8x32xf32>
    %217 = arith.mulf %213, %212 : vector<8x32xf32>
    %218 = arith.addf %216, %217 : vector<8x32xf32>
    %219 = math.tanh %218 : vector<8x32xf32>
    %220 = arith.mulf %215, %219 : vector<8x32xf32>
    %221 = arith.index_cast %198 : i32 to index
    %c0_78 = arith.constant 0 : index
    %222 = vector.load %arg12[%221, %c0_78] : memref<64x32xf32, #tpu.memory_space<vmem>>, vector<8x32xf32>
    tpu.vector_store %arg12[%221, %c0_78], %220 {strides = array<i32>} : memref<64x32xf32, #tpu.memory_space<vmem>>, vector<8x32xf32>,
    %c8_i32_79 = arith.constant 8 : i32
    %c0_80 = arith.constant 0 : index
    %c0_81 = arith.constant 0 : index
    %c0_82 = arith.constant 0 : index
    %223 = vector.load %arg13[%c0_80, %c0_81, %c0_82] : memref<2x8x32xf32, #tpu.memory_space<vmem>>, vector<1x8x32xf32>
    %224 = vector.shape_cast %223 : vector<1x8x32xf32> to vector<8x32xf32>
    %225 = vector.shape_cast %220 : vector<8x32xf32> to vector<1x8x32xf32>
    tpu.vector_store %arg13[%c0_80, %c0_81, %c0_82], %225 {strides = array<i32>} : memref<2x8x32xf32, #tpu.memory_space<vmem>>, vector<1x8x32xf32>,
    %c0_83 = arith.constant 0 : index
    %c0_84 = arith.constant 0 : index
    %c0_85 = arith.constant 0 : index
    %226 = vector.load %arg14[%c0_83, %c0_84, %c0_85] : memref<2x8x32xf32, #tpu.memory_space<vmem>>, vector<1x8x32xf32>
    %227 = vector.shape_cast %226 : vector<1x8x32xf32> to vector<8x32xf32>
    %228 = vector.shape_cast %218 : vector<8x32xf32> to vector<1x8x32xf32>
    tpu.vector_store %arg14[%c0_83, %c0_84, %c0_85], %228 {strides = array<i32>} : memref<2x8x32xf32, #tpu.memory_space<vmem>>, vector<1x8x32xf32>,
    %c0_86 = arith.constant 0 : index
    %c0_87 = arith.constant 0 : index
    %229 = vector.load %arg12[%c0_86, %c0_87] : memref<64x32xf32, #tpu.memory_space<vmem>>, vector<64x32xf32>
    %c0_88 = arith.constant 0 : index
    %c0_89 = arith.constant 0 : index
    %c0_90 = arith.constant 0 : index
    %230 = vector.load %arg8[%c0_88, %c0_89, %c0_90] : memref<1x32x128xf32, #tpu.memory_space<vmem>>, vector<1x32x128xf32>
    %231 = vector.shape_cast %230 : vector<1x32x128xf32> to vector<32x128xf32>
    %cst_91 = arith.constant dense<0.000000e+00> : vector<64x128xf32>
    %232 = tpu.matmul %229, %231, %cst_91 {dimension_numbers = #tpu.dot_dimension_numbers<[1], [0], [0], [1], [0, 0, 1, 1], [], []>} : vector<64x32xf32>, vector<32x128xf32>, vector<64x128xf32> -> vector<64x128xf32>
    %c1 = arith.constant 1 : index
    %c0_92 = arith.constant 0 : index
    %c0_93 = arith.constant 0 : index
    %233 = vector.load %arg10[%c1, %c0_92, %c0_93] : memref<2x1x128xf32, #tpu.memory_space<vmem>>, vector<1x1x128xf32>
    %234 = vector.shape_cast %233 : vector<1x1x128xf32> to vector<1x128xf32>
    %235 = vector.broadcast %234 : vector<1x128xf32> to vector<64x128xf32>
    %236 = arith.addf %232, %235 : vector<64x128xf32>
    %c0_94 = arith.constant 0 : index
    %c0_95 = arith.constant 0 : index
    %237 = vector.load %arg11[%c0_94, %c0_95] : memref<64x128xf32, #tpu.memory_space<vmem>>, vector<64x128xf32>
    tpu.vector_store %arg11[%c0_94, %c0_95], %236 {strides = array<i32>} : memref<64x128xf32, #tpu.memory_space<vmem>>, vector<64x128xf32>,
    %c1_96 = arith.constant 1 : index
    %c0_97 = arith.constant 0 : index
    %c0_98 = arith.constant 0 : index
    %238 = vector.load %arg13[%c1_96, %c0_97, %c0_98] : memref<2x8x32xf32, #tpu.memory_space<vmem>>, vector<1x8x32xf32>
    %239 = vector.shape_cast %238 : vector<1x8x32xf32> to vector<8x32xf32>
    %c1_99 = arith.constant 1 : index
    %c0_100 = arith.constant 0 : index
    %c0_101 = arith.constant 0 : index
    %240 = vector.load %arg14[%c1_99, %c0_100, %c0_101] : memref<2x8x32xf32, #tpu.memory_space<vmem>>, vector<1x8x32xf32>
    %241 = vector.shape_cast %240 : vector<1x8x32xf32> to vector<8x32xf32>
    %c0_i32_102 = arith.constant 0 : i32
    %c8_i32_103 = arith.constant 8 : i32
    %242 = arith.muli %c0_i32_102, %c8_i32_103 : i32
    %243 = tpu.assume_multiple %242, 8 : i32
    %244 = arith.index_cast %243 : i32 to index
    %c0_104 = arith.constant 0 : index
    %245 = vector.load %arg11[%244, %c0_104] : memref<64x128xf32, #tpu.memory_space<vmem>>, vector<8x128xf32>
    %c1_105 = arith.constant 1 : index
    %c0_106 = arith.constant 0 : index
    %c0_107 = arith.constant 0 : index
    %246 = vector.load %arg9[%c1_105, %c0_106, %c0_107] : memref<2x32x128xf32, #tpu.memory_space<vmem>>, vector<1x32x128xf32>
    %247 = vector.shape_cast %246 : vector<1x32x128xf32> to vector<32x128xf32>
    %cst_108 = arith.constant dense<0.000000e+00> : vector<8x128xf32>
    %248 = tpu.matmul %239, %247, %cst_108 {dimension_numbers = #tpu.dot_dimension_numbers<[1], [0], [0], [1], [0, 0, 1, 1], [], []>} : vector<8x32xf32>, vector<32x128xf32>, vector<8x128xf32> -> vector<8x128xf32>
    %249 = arith.addf %245, %248 : vector<8x128xf32>
    %250 = vector.extract_strided_slice %249 {offsets = [0, 0], sizes = [8, 96], strides = [1, 1]} : vector<8x128xf32> to vector<8x96xf32>
    %251 = arith.negf %250 : vector<8x96xf32>
    %252 = math.exp %251 : vector<8x96xf32>
    %cst_109 = arith.constant 1.000000e+00 : f32
    %253 = vector.broadcast %cst_109 : f32 to vector<8x96xf32>
    %254 = arith.addf %253, %252 : vector<8x96xf32>
    %255 = arith.divf %253, %254 : vector<8x96xf32>
    %256 = vector.extract_strided_slice %249 {offsets = [0, 96], sizes = [8, 32], strides = [1, 1]} : vector<8x128xf32> to vector<8x32xf32>
    %257 = math.tanh %256 : vector<8x32xf32>
    %258 = vector.extract_strided_slice %255 {offsets = [0, 0], sizes = [8, 32], strides = [1, 1]} : vector<8x96xf32> to vector<8x32xf32>
    %259 = vector.extract_strided_slice %255 {offsets = [0, 32], sizes = [8, 32], strides = [1, 1]} : vector<8x96xf32> to vector<8x32xf32>
    %260 = vector.extract_strided_slice %255 {offsets = [0, 64], sizes = [8, 32], strides = [1, 1]} : vector<8x96xf32> to vector<8x32xf32>
    %261 = arith.mulf %259, %241 : vector<8x32xf32>
    %262 = arith.mulf %258, %257 : vector<8x32xf32>
    %263 = arith.addf %261, %262 : vector<8x32xf32>
    %264 = math.tanh %263 : vector<8x32xf32>
    %265 = arith.mulf %260, %264 : vector<8x32xf32>
    %c1_i32_110 = arith.constant 1 : i32
    %c8_i32_111 = arith.constant 8 : i32
    %266 = arith.muli %c1_i32_110, %c8_i32_111 : i32
    %267 = tpu.assume_multiple %266, 8 : i32
    %268 = arith.index_cast %267 : i32 to index
    %c0_112 = arith.constant 0 : index
    %269 = vector.load %arg11[%268, %c0_112] : memref<64x128xf32, #tpu.memory_space<vmem>>, vector<8x128xf32>
    %c1_113 = arith.constant 1 : index
    %c0_114 = arith.constant 0 : index
    %c0_115 = arith.constant 0 : index
    %270 = vector.load %arg9[%c1_113, %c0_114, %c0_115] : memref<2x32x128xf32, #tpu.memory_space<vmem>>, vector<1x32x128xf32>
    %271 = vector.shape_cast %270 : vector<1x32x128xf32> to vector<32x128xf32>
    %cst_116 = arith.constant dense<0.000000e+00> : vector<8x128xf32>
    %272 = tpu.matmul %265, %271, %cst_116 {dimension_numbers = #tpu.dot_dimension_numbers<[1], [0], [0], [1], [0, 0, 1, 1], [], []>} : vector<8x32xf32>, vector<32x128xf32>, vector<8x128xf32> -> vector<8x128xf32>
    %273 = arith.addf %269, %272 : vector<8x128xf32>
    %274 = vector.extract_strided_slice %273 {offsets = [0, 0], sizes = [8, 96], strides = [1, 1]} : vector<8x128xf32> to vector<8x96xf32>
    %275 = arith.negf %274 : vector<8x96xf32>
    %276 = math.exp %275 : vector<8x96xf32>
    %cst_117 = arith.constant 1.000000e+00 : f32
    %277 = vector.broadcast %cst_117 : f32 to vector<8x96xf32>
    %278 = arith.addf %277, %276 : vector<8x96xf32>
    %279 = arith.divf %277, %278 : vector<8x96xf32>
    %280 = vector.extract_strided_slice %273 {offsets = [0, 96], sizes = [8, 32], strides = [1, 1]} : vector<8x128xf32> to vector<8x32xf32>
    %281 = math.tanh %280 : vector<8x32xf32>
    %282 = vector.extract_strided_slice %279 {offsets = [0, 0], sizes = [8, 32], strides = [1, 1]} : vector<8x96xf32> to vector<8x32xf32>
    %283 = vector.extract_strided_slice %279 {offsets = [0, 32], sizes = [8, 32], strides = [1, 1]} : vector<8x96xf32> to vector<8x32xf32>
    %284 = vector.extract_strided_slice %279 {offsets = [0, 64], sizes = [8, 32], strides = [1, 1]} : vector<8x96xf32> to vector<8x32xf32>
    %285 = arith.mulf %283, %263 : vector<8x32xf32>
    %286 = arith.mulf %282, %281 : vector<8x32xf32>
    %287 = arith.addf %285, %286 : vector<8x32xf32>
    %288 = math.tanh %287 : vector<8x32xf32>
    %289 = arith.mulf %284, %288 : vector<8x32xf32>
    %c2_i32_118 = arith.constant 2 : i32
    %c8_i32_119 = arith.constant 8 : i32
    %290 = arith.muli %c2_i32_118, %c8_i32_119 : i32
    %291 = tpu.assume_multiple %290, 8 : i32
    %292 = arith.index_cast %291 : i32 to index
    %c0_120 = arith.constant 0 : index
    %293 = vector.load %arg11[%292, %c0_120] : memref<64x128xf32, #tpu.memory_space<vmem>>, vector<8x128xf32>
    %c1_121 = arith.constant 1 : index
    %c0_122 = arith.constant 0 : index
    %c0_123 = arith.constant 0 : index
    %294 = vector.load %arg9[%c1_121, %c0_122, %c0_123] : memref<2x32x128xf32, #tpu.memory_space<vmem>>, vector<1x32x128xf32>
    %295 = vector.shape_cast %294 : vector<1x32x128xf32> to vector<32x128xf32>
    %cst_124 = arith.constant dense<0.000000e+00> : vector<8x128xf32>
    %296 = tpu.matmul %289, %295, %cst_124 {dimension_numbers = #tpu.dot_dimension_numbers<[1], [0], [0], [1], [0, 0, 1, 1], [], []>} : vector<8x32xf32>, vector<32x128xf32>, vector<8x128xf32> -> vector<8x128xf32>
    %297 = arith.addf %293, %296 : vector<8x128xf32>
    %298 = vector.extract_strided_slice %297 {offsets = [0, 0], sizes = [8, 96], strides = [1, 1]} : vector<8x128xf32> to vector<8x96xf32>
    %299 = arith.negf %298 : vector<8x96xf32>
    %300 = math.exp %299 : vector<8x96xf32>
    %cst_125 = arith.constant 1.000000e+00 : f32
    %301 = vector.broadcast %cst_125 : f32 to vector<8x96xf32>
    %302 = arith.addf %301, %300 : vector<8x96xf32>
    %303 = arith.divf %301, %302 : vector<8x96xf32>
    %304 = vector.extract_strided_slice %297 {offsets = [0, 96], sizes = [8, 32], strides = [1, 1]} : vector<8x128xf32> to vector<8x32xf32>
    %305 = math.tanh %304 : vector<8x32xf32>
    %306 = vector.extract_strided_slice %303 {offsets = [0, 0], sizes = [8, 32], strides = [1, 1]} : vector<8x96xf32> to vector<8x32xf32>
    %307 = vector.extract_strided_slice %303 {offsets = [0, 32], sizes = [8, 32], strides = [1, 1]} : vector<8x96xf32> to vector<8x32xf32>
    %308 = vector.extract_strided_slice %303 {offsets = [0, 64], sizes = [8, 32], strides = [1, 1]} : vector<8x96xf32> to vector<8x32xf32>
    %309 = arith.mulf %307, %287 : vector<8x32xf32>
    %310 = arith.mulf %306, %305 : vector<8x32xf32>
    %311 = arith.addf %309, %310 : vector<8x32xf32>
    %312 = math.tanh %311 : vector<8x32xf32>
    %313 = arith.mulf %308, %312 : vector<8x32xf32>
    %c3_i32_126 = arith.constant 3 : i32
    %c8_i32_127 = arith.constant 8 : i32
    %314 = arith.muli %c3_i32_126, %c8_i32_127 : i32
    %315 = tpu.assume_multiple %314, 8 : i32
    %316 = arith.index_cast %315 : i32 to index
    %c0_128 = arith.constant 0 : index
    %317 = vector.load %arg11[%316, %c0_128] : memref<64x128xf32, #tpu.memory_space<vmem>>, vector<8x128xf32>
    %c1_129 = arith.constant 1 : index
    %c0_130 = arith.constant 0 : index
    %c0_131 = arith.constant 0 : index
    %318 = vector.load %arg9[%c1_129, %c0_130, %c0_131] : memref<2x32x128xf32, #tpu.memory_space<vmem>>, vector<1x32x128xf32>
    %319 = vector.shape_cast %318 : vector<1x32x128xf32> to vector<32x128xf32>
    %cst_132 = arith.constant dense<0.000000e+00> : vector<8x128xf32>
    %320 = tpu.matmul %313, %319, %cst_132 {dimension_numbers = #tpu.dot_dimension_numbers<[1], [0], [0], [1], [0, 0, 1, 1], [], []>} : vector<8x32xf32>, vector<32x128xf32>, vector<8x128xf32> -> vector<8x128xf32>
    %321 = arith.addf %317, %320 : vector<8x128xf32>
    %322 = vector.extract_strided_slice %321 {offsets = [0, 0], sizes = [8, 96], strides = [1, 1]} : vector<8x128xf32> to vector<8x96xf32>
    %323 = arith.negf %322 : vector<8x96xf32>
    %324 = math.exp %323 : vector<8x96xf32>
    %cst_133 = arith.constant 1.000000e+00 : f32
    %325 = vector.broadcast %cst_133 : f32 to vector<8x96xf32>
    %326 = arith.addf %325, %324 : vector<8x96xf32>
    %327 = arith.divf %325, %326 : vector<8x96xf32>
    %328 = vector.extract_strided_slice %321 {offsets = [0, 96], sizes = [8, 32], strides = [1, 1]} : vector<8x128xf32> to vector<8x32xf32>
    %329 = math.tanh %328 : vector<8x32xf32>
    %330 = vector.extract_strided_slice %327 {offsets = [0, 0], sizes = [8, 32], strides = [1, 1]} : vector<8x96xf32> to vector<8x32xf32>
    %331 = vector.extract_strided_slice %327 {offsets = [0, 32], sizes = [8, 32], strides = [1, 1]} : vector<8x96xf32> to vector<8x32xf32>
    %332 = vector.extract_strided_slice %327 {offsets = [0, 64], sizes = [8, 32], strides = [1, 1]} : vector<8x96xf32> to vector<8x32xf32>
    %333 = arith.mulf %331, %311 : vector<8x32xf32>
    %334 = arith.mulf %330, %329 : vector<8x32xf32>
    %335 = arith.addf %333, %334 : vector<8x32xf32>
    %336 = math.tanh %335 : vector<8x32xf32>
    %337 = arith.mulf %332, %336 : vector<8x32xf32>
    %c4_i32_134 = arith.constant 4 : i32
    %c8_i32_135 = arith.constant 8 : i32
    %338 = arith.muli %c4_i32_134, %c8_i32_135 : i32
    %339 = tpu.assume_multiple %338, 8 : i32
    %340 = arith.index_cast %339 : i32 to index
    %c0_136 = arith.constant 0 : index
    %341 = vector.load %arg11[%340, %c0_136] : memref<64x128xf32, #tpu.memory_space<vmem>>, vector<8x128xf32>
    %c1_137 = arith.constant 1 : index
    %c0_138 = arith.constant 0 : index
    %c0_139 = arith.constant 0 : index
    %342 = vector.load %arg9[%c1_137, %c0_138, %c0_139] : memref<2x32x128xf32, #tpu.memory_space<vmem>>, vector<1x32x128xf32>
    %343 = vector.shape_cast %342 : vector<1x32x128xf32> to vector<32x128xf32>
    %cst_140 = arith.constant dense<0.000000e+00> : vector<8x128xf32>
    %344 = tpu.matmul %337, %343, %cst_140 {dimension_numbers = #tpu.dot_dimension_numbers<[1], [0], [0], [1], [0, 0, 1, 1], [], []>} : vector<8x32xf32>, vector<32x128xf32>, vector<8x128xf32> -> vector<8x128xf32>
    %345 = arith.addf %341, %344 : vector<8x128xf32>
    %346 = vector.extract_strided_slice %345 {offsets = [0, 0], sizes = [8, 96], strides = [1, 1]} : vector<8x128xf32> to vector<8x96xf32>
    %347 = arith.negf %346 : vector<8x96xf32>
    %348 = math.exp %347 : vector<8x96xf32>
    %cst_141 = arith.constant 1.000000e+00 : f32
    %349 = vector.broadcast %cst_141 : f32 to vector<8x96xf32>
    %350 = arith.addf %349, %348 : vector<8x96xf32>
    %351 = arith.divf %349, %350 : vector<8x96xf32>
    %352 = vector.extract_strided_slice %345 {offsets = [0, 96], sizes = [8, 32], strides = [1, 1]} : vector<8x128xf32> to vector<8x32xf32>
    %353 = math.tanh %352 : vector<8x32xf32>
    %354 = vector.extract_strided_slice %351 {offsets = [0, 0], sizes = [8, 32], strides = [1, 1]} : vector<8x96xf32> to vector<8x32xf32>
    %355 = vector.extract_strided_slice %351 {offsets = [0, 32], sizes = [8, 32], strides = [1, 1]} : vector<8x96xf32> to vector<8x32xf32>
    %356 = vector.extract_strided_slice %351 {offsets = [0, 64], sizes = [8, 32], strides = [1, 1]} : vector<8x96xf32> to vector<8x32xf32>
    %357 = arith.mulf %355, %335 : vector<8x32xf32>
    %358 = arith.mulf %354, %353 : vector<8x32xf32>
    %359 = arith.addf %357, %358 : vector<8x32xf32>
    %360 = math.tanh %359 : vector<8x32xf32>
    %361 = arith.mulf %356, %360 : vector<8x32xf32>
    %c5_i32_142 = arith.constant 5 : i32
    %c8_i32_143 = arith.constant 8 : i32
    %362 = arith.muli %c5_i32_142, %c8_i32_143 : i32
    %363 = tpu.assume_multiple %362, 8 : i32
    %364 = arith.index_cast %363 : i32 to index
    %c0_144 = arith.constant 0 : index
    %365 = vector.load %arg11[%364, %c0_144] : memref<64x128xf32, #tpu.memory_space<vmem>>, vector<8x128xf32>
    %c1_145 = arith.constant 1 : index
    %c0_146 = arith.constant 0 : index
    %c0_147 = arith.constant 0 : index
    %366 = vector.load %arg9[%c1_145, %c0_146, %c0_147] : memref<2x32x128xf32, #tpu.memory_space<vmem>>, vector<1x32x128xf32>
    %367 = vector.shape_cast %366 : vector<1x32x128xf32> to vector<32x128xf32>
    %cst_148 = arith.constant dense<0.000000e+00> : vector<8x128xf32>
    %368 = tpu.matmul %361, %367, %cst_148 {dimension_numbers = #tpu.dot_dimension_numbers<[1], [0], [0], [1], [0, 0, 1, 1], [], []>} : vector<8x32xf32>, vector<32x128xf32>, vector<8x128xf32> -> vector<8x128xf32>
    %369 = arith.addf %365, %368 : vector<8x128xf32>
    %370 = vector.extract_strided_slice %369 {offsets = [0, 0], sizes = [8, 96], strides = [1, 1]} : vector<8x128xf32> to vector<8x96xf32>
    %371 = arith.negf %370 : vector<8x96xf32>
    %372 = math.exp %371 : vector<8x96xf32>
    %cst_149 = arith.constant 1.000000e+00 : f32
    %373 = vector.broadcast %cst_149 : f32 to vector<8x96xf32>
    %374 = arith.addf %373, %372 : vector<8x96xf32>
    %375 = arith.divf %373, %374 : vector<8x96xf32>
    %376 = vector.extract_strided_slice %369 {offsets = [0, 96], sizes = [8, 32], strides = [1, 1]} : vector<8x128xf32> to vector<8x32xf32>
    %377 = math.tanh %376 : vector<8x32xf32>
    %378 = vector.extract_strided_slice %375 {offsets = [0, 0], sizes = [8, 32], strides = [1, 1]} : vector<8x96xf32> to vector<8x32xf32>
    %379 = vector.extract_strided_slice %375 {offsets = [0, 32], sizes = [8, 32], strides = [1, 1]} : vector<8x96xf32> to vector<8x32xf32>
    %380 = vector.extract_strided_slice %375 {offsets = [0, 64], sizes = [8, 32], strides = [1, 1]} : vector<8x96xf32> to vector<8x32xf32>
    %381 = arith.mulf %379, %359 : vector<8x32xf32>
    %382 = arith.mulf %378, %377 : vector<8x32xf32>
    %383 = arith.addf %381, %382 : vector<8x32xf32>
    %384 = math.tanh %383 : vector<8x32xf32>
    %385 = arith.mulf %380, %384 : vector<8x32xf32>
    %c6_i32_150 = arith.constant 6 : i32
    %c8_i32_151 = arith.constant 8 : i32
    %386 = arith.muli %c6_i32_150, %c8_i32_151 : i32
    %387 = tpu.assume_multiple %386, 8 : i32
    %388 = arith.index_cast %387 : i32 to index
    %c0_152 = arith.constant 0 : index
    %389 = vector.load %arg11[%388, %c0_152] : memref<64x128xf32, #tpu.memory_space<vmem>>, vector<8x128xf32>
    %c1_153 = arith.constant 1 : index
    %c0_154 = arith.constant 0 : index
    %c0_155 = arith.constant 0 : index
    %390 = vector.load %arg9[%c1_153, %c0_154, %c0_155] : memref<2x32x128xf32, #tpu.memory_space<vmem>>, vector<1x32x128xf32>
    %391 = vector.shape_cast %390 : vector<1x32x128xf32> to vector<32x128xf32>
    %cst_156 = arith.constant dense<0.000000e+00> : vector<8x128xf32>
    %392 = tpu.matmul %385, %391, %cst_156 {dimension_numbers = #tpu.dot_dimension_numbers<[1], [0], [0], [1], [0, 0, 1, 1], [], []>} : vector<8x32xf32>, vector<32x128xf32>, vector<8x128xf32> -> vector<8x128xf32>
    %393 = arith.addf %389, %392 : vector<8x128xf32>
    %394 = vector.extract_strided_slice %393 {offsets = [0, 0], sizes = [8, 96], strides = [1, 1]} : vector<8x128xf32> to vector<8x96xf32>
    %395 = arith.negf %394 : vector<8x96xf32>
    %396 = math.exp %395 : vector<8x96xf32>
    %cst_157 = arith.constant 1.000000e+00 : f32
    %397 = vector.broadcast %cst_157 : f32 to vector<8x96xf32>
    %398 = arith.addf %397, %396 : vector<8x96xf32>
    %399 = arith.divf %397, %398 : vector<8x96xf32>
    %400 = vector.extract_strided_slice %393 {offsets = [0, 96], sizes = [8, 32], strides = [1, 1]} : vector<8x128xf32> to vector<8x32xf32>
    %401 = math.tanh %400 : vector<8x32xf32>
    %402 = vector.extract_strided_slice %399 {offsets = [0, 0], sizes = [8, 32], strides = [1, 1]} : vector<8x96xf32> to vector<8x32xf32>
    %403 = vector.extract_strided_slice %399 {offsets = [0, 32], sizes = [8, 32], strides = [1, 1]} : vector<8x96xf32> to vector<8x32xf32>
    %404 = vector.extract_strided_slice %399 {offsets = [0, 64], sizes = [8, 32], strides = [1, 1]} : vector<8x96xf32> to vector<8x32xf32>
    %405 = arith.mulf %403, %383 : vector<8x32xf32>
    %406 = arith.mulf %402, %401 : vector<8x32xf32>
    %407 = arith.addf %405, %406 : vector<8x32xf32>
    %408 = math.tanh %407 : vector<8x32xf32>
    %409 = arith.mulf %404, %408 : vector<8x32xf32>
    %c7_i32_158 = arith.constant 7 : i32
    %c8_i32_159 = arith.constant 8 : i32
    %410 = arith.muli %c7_i32_158, %c8_i32_159 : i32
    %411 = tpu.assume_multiple %410, 8 : i32
    %412 = arith.index_cast %411 : i32 to index
    %c0_160 = arith.constant 0 : index
    %413 = vector.load %arg11[%412, %c0_160] : memref<64x128xf32, #tpu.memory_space<vmem>>, vector<8x128xf32>
    %c1_161 = arith.constant 1 : index
    %c0_162 = arith.constant 0 : index
    %c0_163 = arith.constant 0 : index
    %414 = vector.load %arg9[%c1_161, %c0_162, %c0_163] : memref<2x32x128xf32, #tpu.memory_space<vmem>>, vector<1x32x128xf32>
    %415 = vector.shape_cast %414 : vector<1x32x128xf32> to vector<32x128xf32>
    %cst_164 = arith.constant dense<0.000000e+00> : vector<8x128xf32>
    %416 = tpu.matmul %409, %415, %cst_164 {dimension_numbers = #tpu.dot_dimension_numbers<[1], [0], [0], [1], [0, 0, 1, 1], [], []>} : vector<8x32xf32>, vector<32x128xf32>, vector<8x128xf32> -> vector<8x128xf32>
    %417 = arith.addf %413, %416 : vector<8x128xf32>
    %418 = vector.extract_strided_slice %417 {offsets = [0, 0], sizes = [8, 96], strides = [1, 1]} : vector<8x128xf32> to vector<8x96xf32>
    %419 = arith.negf %418 : vector<8x96xf32>
    %420 = math.exp %419 : vector<8x96xf32>
    %cst_165 = arith.constant 1.000000e+00 : f32
    %421 = vector.broadcast %cst_165 : f32 to vector<8x96xf32>
    %422 = arith.addf %421, %420 : vector<8x96xf32>
    %423 = arith.divf %421, %422 : vector<8x96xf32>
    %424 = vector.extract_strided_slice %417 {offsets = [0, 96], sizes = [8, 32], strides = [1, 1]} : vector<8x128xf32> to vector<8x32xf32>
    %425 = math.tanh %424 : vector<8x32xf32>
    %426 = vector.extract_strided_slice %423 {offsets = [0, 0], sizes = [8, 32], strides = [1, 1]} : vector<8x96xf32> to vector<8x32xf32>
    %427 = vector.extract_strided_slice %423 {offsets = [0, 32], sizes = [8, 32], strides = [1, 1]} : vector<8x96xf32> to vector<8x32xf32>
    %428 = vector.extract_strided_slice %423 {offsets = [0, 64], sizes = [8, 32], strides = [1, 1]} : vector<8x96xf32> to vector<8x32xf32>
    %429 = arith.mulf %427, %407 : vector<8x32xf32>
    %430 = arith.mulf %426, %425 : vector<8x32xf32>
    %431 = arith.addf %429, %430 : vector<8x32xf32>
    %432 = math.tanh %431 : vector<8x32xf32>
    %433 = arith.mulf %428, %432 : vector<8x32xf32>
    %c8_i32_166 = arith.constant 8 : i32
    %c1_167 = arith.constant 1 : index
    %c0_168 = arith.constant 0 : index
    %c0_169 = arith.constant 0 : index
    %434 = vector.load %arg13[%c1_167, %c0_168, %c0_169] : memref<2x8x32xf32, #tpu.memory_space<vmem>>, vector<1x8x32xf32>
    %435 = vector.shape_cast %434 : vector<1x8x32xf32> to vector<8x32xf32>
    %436 = vector.shape_cast %433 : vector<8x32xf32> to vector<1x8x32xf32>
    tpu.vector_store %arg13[%c1_167, %c0_168, %c0_169], %436 {strides = array<i32>} : memref<2x8x32xf32, #tpu.memory_space<vmem>>, vector<1x8x32xf32>,
    %c1_170 = arith.constant 1 : index
    %c0_171 = arith.constant 0 : index
    %c0_172 = arith.constant 0 : index
    %437 = vector.load %arg14[%c1_170, %c0_171, %c0_172] : memref<2x8x32xf32, #tpu.memory_space<vmem>>, vector<1x8x32xf32>
    %438 = vector.shape_cast %437 : vector<1x8x32xf32> to vector<8x32xf32>
    %439 = vector.shape_cast %431 : vector<8x32xf32> to vector<1x8x32xf32>
    tpu.vector_store %arg14[%c1_170, %c0_171, %c0_172], %439 {strides = array<i32>} : memref<2x8x32xf32, #tpu.memory_space<vmem>>, vector<1x8x32xf32>,
    %c0_173 = arith.constant 0 : index
    %c0_174 = arith.constant 0 : index
    %440 = vector.load %arg6[%c0_173, %c0_174] : memref<8x32xf32, #tpu.memory_space<vmem>>, vector<8x32xf32>
    tpu.vector_store %arg6[%c0_173, %c0_174], %433 {strides = array<i32>} : memref<8x32xf32, #tpu.memory_space<vmem>>, vector<8x32xf32>,
    return
  }
  func.func @transform_0(%arg0: i32) -> (i32, i32) {
    %c0_i32 = arith.constant 0 : i32
    %c0_i32_0 = arith.constant 0 : i32
    return %arg0, %c0_i32 : i32, i32
  }
  func.func @transform_5(%arg0: i32) -> (i32, i32) {
    %c0_i32 = arith.constant 0 : i32
    %c0_i32_0 = arith.constant 0 : i32
    %c0_i32_1 = arith.constant 0 : i32
    return %c0_i32, %c0_i32_0 : i32, i32
  }
}

</mosaic_0001>

<bundles_post_ra>
// kernel: tpu_custom_call.1
= control target key start
LH: loop header
LB: loop body
LE: loop exit
PB: predicated region body
PF: predicated region fallthrough
CT: control target
= control target key end

     0   :  { %10 = vsyncpa [#allocation12], 0  ;;  %s3295_s0 = inlined_call_operand.vmem [shape: f32[64,16], index: 0, kind: input, shape index: {}]   ;;  %s3296_s1 = inlined_call_operand.vmem [shape: f32[16,128], index: 1, kind: input, shape index: {}]   ;;  %s3297_s2 = inlined_call_operand.hbm [shape: f32[1,32,128], index: 2, kind: input, shape index: {}]   ;;  %s3298_s3 = inlined_call_operand.vmem [shape: f32[2,32,128], index: 3, kind: input, shape index: {}]   ;;  %s3299_s4 = inlined_call_operand.vmem [shape: f32[2,1,128], index: 4, kind: input, shape index: {}]   ;;  %s3300_s5 = inlined_call_operand.hbm [shape: f32[8,32], index: 5, kind: output, shape index: {}]  }
   0x1   :  { %v50_v0 = vld [vmem:[%s3296_s1] sm:$0xff]  ;;  %v52_v1 = vld [vmem:[%s3296_s1 + $0x8] sm:$0xff] }
   0x2   :  { %61 = vsyncadd [#allocation10], 256  ;;  %v2891_v2 = vld [vmem:[%s3298_s3] sm:$0xff]  ;;  %v2896_v3 = vld [vmem:[%s3298_s3 + $0x8] sm:$0xff]  ;;  %s2845_s26 = smov [#allocation3]  }
   0x3   :  { %s70_s27 = sshll.u32 %s2845_s26, 4  ;;  %v2901_v4 = vld [vmem:[%s3298_s3 + $0x10] sm:$0xff]  ;;  %v2906_v5 = vld [vmem:[%s3298_s3 + $0x18] sm:$0xff]  ;;  %v2911_v6 = vld [vmem:[%s3298_s3 + $0x20] sm:$0xff]  ;;  %s71_s27 = int_to_ptr.vmem [resolvable:$true] %s70_s27 }
   0x4   :  { %v2916_v7 = vld [vmem:[%s3298_s3 + $0x28] sm:$0xff]  ;;  %v2921_v8 = vld [vmem:[%s3298_s3 + $0x30] sm:$0xff]  ;;  %v2926_v9 = vld [vmem:[%s3298_s3 + $0x38] sm:$0xff]  ;;  %s2803_s14 = scalar_lea.vmem %s71_s27, 512  ;;  %p2808_p1 = scmp.lt.s32.totalorder %s71_s27, %s71_s27 }
   0x5   :  { %p2804_p0 = scmp.ne.s32.totalorder %s71_s27, %s2803_s14  ;;  %p2809_p2 = scmp.lt.s32.totalorder %s2803_s14, %s2803_s14 }
   0x7   :  { %p2810_p3 = por %p2809_p2, %p2808_p1 }
   0x9   :  { %p2811_p4 = pnand %p2810_p3, %p2804_p0 }
   0xb   :  { %2814 = shalt.err (!%p2811_p4)  }
   0xc   :  { %73 = dma.hbm_to_vmem [thread:$0]  %s3297_s2, 512, %s71_s27, [#allocation10 + $0x1] }
   0xd   :  { %131 = vsyncadd [#allocation10 + $0x2], 1024  ;;  %v151_v10 = vld [vmem:[%s3299_s4] sm:$0x3] }
   0xe   :  { %152 = vst [vmem:[#allocation5] sm:$0x3] %v151_v10 }
   0xf   :  { %178 = vsyncadd [#allocation10 + $0x3], 32 }
  0x10   :  { %2835 = dma.done.wait [#allocation10], 256 }
  0x11   :  { %2836 = vsyncadd [#allocation10], 4294967040 }
  0x12   :  { %2837 = dma.done.wait [#allocation10 + $0x1], 512 }
  0x13   :  { %2838 = vsyncadd [#allocation10 + $0x1], 4294966784 }
  0x14   :  { %2839 = dma.done.wait [#allocation10 + $0x2], 1024 }
  0x15   :  { %2840 = vsyncadd [#allocation10 + $0x2], 4294966272 }
  0x16   :  { %2841 = dma.done.wait [#allocation10 + $0x3], 32 }
  0x17   :  { %2842 = vsyncadd [#allocation10 + $0x3], 4294967264  ;;  %2448 = vmatprep.subr.mxu0 %v52_v1  ;;  %vm194_vm0 = vcmask 261120   ;;  %v2846_v11 = vmov 0.0   ;;  %vm2847_vm1 = vmmov 0   ;;  %vm216_vm2 = vcmask 130048  }
  0x18   :  { %2464 = vmatprep.subr.mxu1 %v2846_v11  ;;  %2449 = vmatpush3.msra.mxu0 %v52_v1  ;;  %195 = vst.msk [vmem:[#allocation8] sm:$0xff] %vm194_vm0, %v2846_v11  ;;  %196 = vst.msk [vmem:[#allocation8 + $0x8] sm:$0xff] %vm194_vm0, %v2846_v11  ;;  %v199_v12 = vld [vmem:[%s3295_s0] sm:$0xff]  ;;  %v200_v13 = vld [vmem:[%s3295_s0 + $0x8] sm:$0xff]  ;;  %s2848_s20 = smov 32   ;;  %s2849_s21 = smov 64  }
  0x19   :  { %197 = vst.msk [vmem:[#allocation9] sm:$0xff] %vm194_vm0, %v2846_v11  ;;  %198 = vst.msk [vmem:[#allocation9 + $0x8] sm:$0xff] %vm194_vm0, %v2846_v11  ;;  %2465 = vmatpush3.msra.mxu1 %v2906_v5  ;;  %2450 = vmatprep.subr.mxu0 %v50_v0  ;;  %v2981_v17 = vld [vmem:[#allocation5] ss:$0 sm:$0xff]  ;;  %v201_v52 = vld [vmem:[%s3295_s0 + $0x10] sm:$0xff]  ;;  %s2851_s8 = smov [#allocation11]  }
  0x1a   :  { %2466 = vmatprep.subr.mxu1 %v2846_v11  ;;  %2451 = vmatpush3.msra.mxu0 %v50_v0  ;;  %v202_v53 = vld [vmem:[%s3295_s0 + $0x18] sm:$0xff]  ;;  %v203_v54 = vld [vmem:[%s3295_s0 + $0x20] sm:$0xff]  ;;  %v204_v55 = vld [vmem:[%s3295_s0 + $0x28] sm:$0xff]  ;;  %s2231_s9 = sshll.u32 %s2851_s8, 4  ;;  %s2232_s9 = int_to_ptr.vmem [resolvable:$true] %s2231_s9 }
  0x1b   :  { %2467 = vmatpush3.msra.mxu1 %v2901_v4  ;;  %2472 = vmatprep.mubr.msk.f32.mxu1 %vm2847_vm1, %v2846_v11  ;;  %v205_v56 = vld [vmem:[%s3295_s0 + $0x30] sm:$0xff]  ;;  %v206_v57 = vld [vmem:[%s3295_s0 + $0x38] sm:$0xff]  ;;  %s2850_s0 = smov 96   ;;  %s2815_s10 = scalar_lea.vmem %s2232_s9, 128 }
  0x1c   :  { %2468 = vmatprep.subr.mxu1 %v2846_v11  ;;  %2486 = vmatprep.subr.mxu0 %v2846_v11  ;;  %p2816_p5 = scmp.ne.s32.totalorder %s2232_s9, %s2815_s10  ;;  %p2820_p6 = scmp.lt.s32.totalorder %s2232_s9, %s2232_s9 }
  0x1d   :  { %2469 = vmatpush3.msra.mxu1 %v2896_v3  ;;  %2452 = vmatprep.mubr.msk.f32.mxu0 %vm216_vm2, %v199_v12  ;;  %p2821_p7 = scmp.lt.s32.totalorder %s2815_s10, %s2815_s10 }
  0x1e   :  { %2470 = vmatprep.subr.mxu1 %v2846_v11  ;;  %2453 = vmatmul.mubr.msk.f32.vlgmr.msra.gmra.mxu0 %vm216_vm2, %v200_v13 }
  0x1f   :  { %2471 = vmatpush3.msra.mxu1 %v2891_v2  ;;  %v354_v14 = vld [vmem:[#allocation8] sm:$0xff]  ;;  %2487 = vmatpush3.msra.mxu0 %v2906_v5  ;;  %p2822_p8 = por %p2821_p7, %p2820_p6 }
  0x20   :  { %2473 = vmatmul.mubr.msk.f32.vlgmr.msra.gmra.mxu1 %vm194_vm0, %v354_v14  ;;  %2475 = vmatprep.subr.mxu1 %v2846_v11  ;;  %v355_v23 = vld [vmem:[#allocation9] sm:$0xff] }
  0x21   :  { %2483 = vmatprep.mubr.msk.f32.mxu1 %vm2847_vm1, %v2846_v11  ;;  %2476 = vmatpush3.msra.mxu1 %v2906_v5  ;;  %p2823_p9 = pnand %p2822_p8, %p2816_p5 }
  0x22   :  { %2477 = vmatprep.subr.mxu1 %v2846_v11  ;;  %2488 = vmatprep.subr.mxu0 %v2846_v11 }
  0x23   :  { %2478 = vmatpush3.msra.mxu1 %v2901_v4  ;;  %2489 = vmatpush3.msra.mxu0 %v2901_v4 }
  0x24   :  { %2479 = vmatprep.subr.mxu1 %v2846_v11  ;;  %2490 = vmatprep.subr.mxu0 %v2846_v11 }
  0x25   :  { %2480 = vmatpush3.msra.mxu1 %v2896_v3  ;;  %2491 = vmatpush3.msra.mxu0 %v2896_v3 }
  0x26   :  { %2481 = vmatprep.subr.mxu1 %v2846_v11  ;;  %2492 = vmatprep.subr.mxu0 %v2846_v11 }
  0x27   :  { %2482 = vmatpush3.msra.mxu1 %v2891_v2  ;;  %2493 = vmatpush3.msra.mxu0 %v2891_v2 }
  0x28   :  { %2497 = vmatprep.subr.mxu1 %v2846_v11  ;;  %2508 = vmatprep.subr.mxu0 %v2846_v11 }
  0x29   :  { %2455 = vmatprep.mubr.msk.f32.mxu0 %vm216_vm2, %v201_v52 }
  0x2a   :  { %2456 = vmatmul.mubr.msk.f32.gmra.mxu0 %vm216_vm2, %v202_v53 }
  0x2b   :  { %2458 = vmatprep.mubr.msk.f32.mxu0 %vm216_vm2, %v203_v54 }
  0x2e   :  { %2459 = vmatmul.mubr.msk.f32.gmra.mxu0 %vm216_vm2, %v204_v55 }
  0x2f   :  { %2461 = vmatprep.mubr.msk.f32.mxu0 %vm216_vm2, %v205_v56 }
  0x32   :  { %2462 = vmatmul.mubr.msk.f32.gmra.mxu0 %vm216_vm2, %v206_v57 }
  0x33   :  { %2494 = vmatprep.mubr.msk.f32.mxu0 %vm2847_vm1, %v2846_v11 }
  0xde   :  { %v2454_v15 = vpop.f32.mrf.mxu0 }
  0xdf   :  { %v313_v38 = vadd.f32 %v2454_v15, %v2981_v17 }
  0xe0   :  { %v431_v16 = vpop.f32.mrf.mxu1  ;;  %v307_v18 = vpop.f32.mrf.mxu0 }
  0xe1   :  { %v308_v20 = vadd.f32 %v2981_v17, %v307_v18 }
  0xe2   :  { %v2474_v19 = vpop.f32.mrf.mxu1 }
  0xe3   :  { %v435_v21 = vadd.f32 %v431_v16, %v308_v20 }
  0xe5   :  { %2667 = vtanh.f32 %v435_v21  ;;  %v2302_v24 = vmul.f32 -1.442695, %v435_v21 }
  0xe7   :  { %2669 = vpow2.f32 %v2302_v24 }
  0xea   :  { %v2457_v62 = vpop.f32.mrf.mxu0 }
  0xec   :  { %v317_v63 = vpop.f32.mrf.mxu0 }
  0xed   :  { %v318_v13 = vadd.f32 %v2981_v17, %v317_v63 }
  0xee   :  { %v3044_v0 = vpop.f32.mrf.mxu0 }
  0xf0   :  { %v3046_v1 = vpop.f32.mrf.mxu0 }
  0xf2   :  { %v2668_v22 = vpop.eup %2667  ;;  %v3048_v10 = vpop.f32.mrf.mxu0 }
  0xf3   :  { %449 = vrot.lane.b32.xlu0 %v2668_v22, %s2848_s20 }
  0xf4   :  { %v2670_v25 = vpop.eup %2669  ;;  %v3050_v12 = vpop.f32.mrf.mxu0 }
  0xf5   :  { %v439_v26 = vadd.f32 1.0, %v2670_v25 }
  0xf7   :  { %444 = vrot.lane.b32.xlu0 %v355_v23, %s2848_s20  ;;  %2671 = vrcp.f32 %v439_v26 }
 0x104   :  { %v2672_v27 = vpop.eup %2671 }
 0x165   :  { %v450_v28 = vpop.permute.xlu0 %449 }
 0x166   :  { %v452_v29 = vmul.f32 %v2672_v27, %v450_v28 }
 0x168   :  { %454 = vrot.lane.b32.xlu1 %v452_v29, %s2848_s20 }
 0x169   :  { %v445_v30 = vpop.permute.xlu0 %444 }
 0x16a   :  { %v447_v31 = vmul.f32 %v2672_v27, %v445_v30 }
 0x1da   :  { %v455_v32 = vpop.permute.xlu1 %454 }
 0x1db   :  { %v457_v33 = vadd.f32 %v455_v32, %v447_v31  ;;  %v323_v32 = vadd.f32 %v2457_v62, %v2981_v17 }
 0x1dd   :  { %2673 = vtanh.f32 %v457_v33 }
 0x1ea   :  { %v2674_v34 = vpop.eup %2673 }
 0x1eb   :  { %460 = vrot.lane.b32.xlu1 %v2674_v34, %s2848_s20 }
 0x25d   :  { %v461_v35 = vpop.permute.xlu1 %460 }
 0x25e   :  { %v463_v36 = vmul.f32 %v2672_v27, %v461_v35 }
 0x260   :  { %465 = vrot.lane.b32.xlu0 %v463_v36, %s2849_s21 }
 0x2d2   :  { %v466_v37 = vpop.permute.xlu0 %465 }
 0x2d3   :  { %468 = vst.msk [vmem:[#allocation7] sm:$0xff] %vm194_vm0, %v466_v37  ;;  %2484 = vmatmul.mubr.msk.f32.vlgmr.msra.gmra.mxu1 %vm194_vm0, %v466_v37 }
 0x2d4   :  { %2498 = vmatpush3.msra.mxu1 %v2906_v5  ;;  %2505 = vmatprep.mubr.msk.f32.mxu1 %vm2847_vm1, %v2846_v11 }
 0x2d5   :  { %2499 = vmatprep.subr.mxu1 %v2846_v11 }
 0x2d6   :  { %2500 = vmatpush3.msra.mxu1 %v2901_v4 }
 0x2d7   :  { %2501 = vmatprep.subr.mxu1 %v2846_v11 }
 0x2d8   :  { %2502 = vmatpush3.msra.mxu1 %v2896_v3 }
 0x2d9   :  { %2503 = vmatprep.subr.mxu1 %v2846_v11 }
 0x2da   :  { %2504 = vmatpush3.msra.mxu1 %v2891_v2 }
 0x2db   :  { %2519 = vmatprep.subr.mxu1 %v2846_v11 }
 0x393   :  { %v543_v39 = vpop.f32.mrf.mxu1 }
 0x394   :  { %v547_v40 = vadd.f32 %v543_v39, %v313_v38 }
 0x395   :  { %v2485_v41 = vpop.f32.mrf.mxu1 }
 0x396   :  { %2675 = vtanh.f32 %v547_v40  ;;  %v2304_v43 = vmul.f32 -1.442695, %v547_v40 }
 0x398   :  { %2677 = vpow2.f32 %v2304_v43 }
 0x3a3   :  { %v2676_v42 = vpop.eup %2675 }
 0x3a4   :  { %557 = vrot.lane.b32.xlu1 %v2676_v42, %s2848_s20 }
 0x3a5   :  { %v2678_v44 = vpop.eup %2677 }
 0x3a6   :  { %v551_v45 = vadd.f32 1.0, %v2678_v44 }
 0x3a8   :  { %2679 = vrcp.f32 %v551_v45 }
 0x3b5   :  { %v2680_v46 = vpop.eup %2679 }
 0x3b6   :  { %v555_v49 = vmul.f32 %v2680_v46, %v457_v33 }
 0x416   :  { %v558_v47 = vpop.permute.xlu1 %557 }
 0x417   :  { %v560_v48 = vmul.f32 %v2680_v46, %v558_v47 }
 0x419   :  { %562 = vrot.lane.b32.xlu0 %v560_v48, %s2848_s20 }
 0x48b   :  { %v563_v50 = vpop.permute.xlu0 %562 }
 0x48c   :  { %v565_v51 = vadd.f32 %v563_v50, %v555_v49  ;;  %v328_v50 = vadd.f32 %v2981_v17, %v3046_v1 }
 0x48e   :  { %2681 = vtanh.f32 %v565_v51 }
 0x49b   :  { %v2682_v58 = vpop.eup %2681 }
 0x49c   :  { %568 = vrot.lane.b32.xlu1 %v2682_v58, %s2848_s20 }
 0x50e   :  { %v569_v59 = vpop.permute.xlu1 %568 }
 0x50f   :  { %v571_v60 = vmul.f32 %v2680_v46, %v569_v59 }
 0x511   :  { %573 = vrot.lane.b32.xlu0 %v571_v60, %s2849_s21 }
 0x583   :  { %v574_v61 = vpop.permute.xlu0 %573 }
 0x584   :  { %577 = vst.msk [vmem:[#allocation7 + $0x8] sm:$0xff] %vm194_vm0, %v574_v61  ;;  %2495 = vmatmul.mubr.msk.f32.vlgmr.msra.gmra.mxu0 %vm194_vm0, %v574_v61 }
 0x585   :  { %2509 = vmatpush3.msra.mxu0 %v2906_v5  ;;  %2516 = vmatprep.mubr.msk.f32.mxu0 %vm2847_vm1, %v2846_v11 }
 0x586   :  { %2510 = vmatprep.subr.mxu0 %v2846_v11 }
 0x587   :  { %2511 = vmatpush3.msra.mxu0 %v2901_v4 }
 0x588   :  { %2512 = vmatprep.subr.mxu0 %v2846_v11 }
 0x589   :  { %2513 = vmatpush3.msra.mxu0 %v2896_v3 }
 0x58a   :  { %2514 = vmatprep.subr.mxu0 %v2846_v11 }
 0x58b   :  { %2515 = vmatpush3.msra.mxu0 %v2891_v2 }
 0x58c   :  { %2530 = vmatprep.subr.mxu0 %v2846_v11 }
 0x644   :  { %v652_v14 = vpop.f32.mrf.mxu0 }
 0x645   :  { %v656_v15 = vadd.f32 %v652_v14, %v318_v13 }
 0x646   :  { %v2496_v16 = vpop.f32.mrf.mxu0 }
 0x647   :  { %2683 = vtanh.f32 %v656_v15  ;;  %v2306_v19 = vmul.f32 -1.442695, %v656_v15 }
 0x649   :  { %2685 = vpow2.f32 %v2306_v19 }
 0x654   :  { %v2684_v18 = vpop.eup %2683 }
 0x655   :  { %666 = vrot.lane.b32.xlu1 %v2684_v18, %s2848_s20 }
 0x656   :  { %v2686_v20 = vpop.eup %2685 }
 0x657   :  { %v660_v21 = vadd.f32 1.0, %v2686_v20 }
 0x659   :  { %2687 = vrcp.f32 %v660_v21 }
 0x666   :  { %v2688_v22 = vpop.eup %2687 }
 0x667   :  { %v664_v25 = vmul.f32 %v2688_v22, %v565_v51 }
 0x6c7   :  { %v667_v23 = vpop.permute.xlu1 %666 }
 0x6c8   :  { %v669_v24 = vmul.f32 %v2688_v22, %v667_v23 }
 0x6ca   :  { %671 = vrot.lane.b32.xlu0 %v669_v24, %s2848_s20 }
 0x73c   :  { %v672_v26 = vpop.permute.xlu0 %671 }
 0x73d   :  { %v674_v27 = vadd.f32 %v672_v26, %v664_v25  ;;  %v1249_v26 = vld [vmem:[#allocation3 + $0x18] sm:$0xff] }
 0x73f   :  { %2689 = vtanh.f32 %v674_v27 }
 0x74c   :  { %v2690_v28 = vpop.eup %2689 }
 0x74d   :  { %677 = vrot.lane.b32.xlu1 %v2690_v28, %s2848_s20 }
 0x7bf   :  { %v678_v29 = vpop.permute.xlu1 %677 }
 0x7c0   :  { %v680_v30 = vmul.f32 %v2688_v22, %v678_v29 }
 0x7c2   :  { %682 = vrot.lane.b32.xlu0 %v680_v30, %s2849_s21 }
 0x834   :  { %v683_v31 = vpop.permute.xlu0 %682 }
 0x835   :  { %686 = vst.msk [vmem:[#allocation7 + $0x10] sm:$0xff] %vm194_vm0, %v683_v31  ;;  %2506 = vmatmul.mubr.msk.f32.vlgmr.msra.gmra.mxu1 %vm194_vm0, %v683_v31  ;;  %v1248_v31 = vld [vmem:[#allocation3 + $0x10] sm:$0xff] }
 0x836   :  { %2520 = vmatpush3.msra.mxu1 %v2906_v5  ;;  %2527 = vmatprep.mubr.msk.f32.mxu1 %vm2847_vm1, %v2846_v11 }
 0x837   :  { %2521 = vmatprep.subr.mxu1 %v2846_v11 }
 0x838   :  { %2522 = vmatpush3.msra.mxu1 %v2901_v4 }
 0x839   :  { %2523 = vmatprep.subr.mxu1 %v2846_v11 }
 0x83a   :  { %2524 = vmatpush3.msra.mxu1 %v2896_v3 }
 0x83b   :  { %2525 = vmatprep.subr.mxu1 %v2846_v11 }
 0x83c   :  { %2526 = vmatpush3.msra.mxu1 %v2891_v2 }
 0x83d   :  { %2541 = vmatprep.subr.mxu1 %v2846_v11 }
 0x8f5   :  { %v761_v33 = vpop.f32.mrf.mxu1 }
 0x8f6   :  { %v765_v34 = vadd.f32 %v761_v33, %v323_v32  ;;  %v1238_v32 = vld [vmem:[#allocation7] sm:$0xff] }
 0x8f7   :  { %v2507_v35 = vpop.f32.mrf.mxu1  ;;  %v1247_v33 = vld [vmem:[#allocation3 + $0x8] sm:$0xff] }
 0x8f8   :  { %2691 = vtanh.f32 %v765_v34  ;;  %v2308_v37 = vmul.f32 -1.442695, %v765_v34  ;;  %v1246_v34 = vld [vmem:[#allocation3] sm:$0xff]  ;;  %v1239_v35 = vld [vmem:[#allocation7 + $0x8] sm:$0xff] }
 0x8fa   :  { %2693 = vpow2.f32 %v2308_v37 }
 0x905   :  { %v2692_v36 = vpop.eup %2691 }
 0x906   :  { %775 = vrot.lane.b32.xlu1 %v2692_v36, %s2848_s20  ;;  %v1240_v36 = vld [vmem:[#allocation7 + $0x10] sm:$0xff] }
 0x907   :  { %v2694_v38 = vpop.eup %2693 }
 0x908   :  { %v769_v39 = vadd.f32 1.0, %v2694_v38 }
 0x90a   :  { %2695 = vrcp.f32 %v769_v39 }
 0x917   :  { %v2696_v40 = vpop.eup %2695 }
 0x918   :  { %v773_v43 = vmul.f32 %v2696_v40, %v674_v27 }
 0x978   :  { %v776_v41 = vpop.permute.xlu1 %775 }
 0x979   :  { %v778_v42 = vmul.f32 %v2696_v40, %v776_v41 }
 0x97b   :  { %780 = vrot.lane.b32.xlu0 %v778_v42, %s2848_s20 }
 0x9ed   :  { %v781_v44 = vpop.permute.xlu0 %780 }
 0x9ee   :  { %v783_v45 = vadd.f32 %v781_v44, %v773_v43 }
 0x9f0   :  { %2697 = vtanh.f32 %v783_v45 }
 0x9fd   :  { %v2698_v46 = vpop.eup %2697 }
 0x9fe   :  { %786 = vrot.lane.b32.xlu1 %v2698_v46, %s2848_s20 }
 0xa70   :  { %v787_v47 = vpop.permute.xlu1 %786 }
 0xa71   :  { %v789_v48 = vmul.f32 %v2696_v40, %v787_v47  ;;  %v338_v40 = vadd.f32 %v2981_v17, %v3050_v12 }
 0xa73   :  { %791 = vrot.lane.b32.xlu0 %v789_v48, %s2849_s21 }
 0xae5   :  { %v792_v49 = vpop.permute.xlu0 %791 }
 0xae6   :  { %795 = vst.msk [vmem:[#allocation7 + $0x18] sm:$0xff] %vm194_vm0, %v792_v49  ;;  %2517 = vmatmul.mubr.msk.f32.vlgmr.msra.gmra.mxu0 %vm194_vm0, %v792_v49 }
 0xae7   :  { %2531 = vmatpush3.msra.mxu0 %v2906_v5  ;;  %2538 = vmatprep.mubr.msk.f32.mxu0 %vm2847_vm1, %v2846_v11 }
 0xae8   :  { %2532 = vmatprep.subr.mxu0 %v2846_v11 }
 0xae9   :  { %2533 = vmatpush3.msra.mxu0 %v2901_v4 }
 0xaea   :  { %2534 = vmatprep.subr.mxu0 %v2846_v11 }
 0xaeb   :  { %2535 = vmatpush3.msra.mxu0 %v2896_v3 }
 0xaec   :  { %2536 = vmatprep.subr.mxu0 %v2846_v11 }
 0xaed   :  { %2537 = vmatpush3.msra.mxu0 %v2891_v2  ;;  %v1241_v37 = vld [vmem:[#allocation7 + $0x18] sm:$0xff] }
 0xaee   :  { %2552 = vmatprep.subr.mxu0 %v1249_v26 }
 0xba6   :  { %v870_v51 = vpop.f32.mrf.mxu0 }
 0xba7   :  { %v874_v52 = vadd.f32 %v870_v51, %v328_v50 }
 0xba8   :  { %v2518_v53 = vpop.f32.mrf.mxu0 }
 0xba9   :  { %2699 = vtanh.f32 %v874_v52  ;;  %v2310_v55 = vmul.f32 -1.442695, %v874_v52 }
 0xbab   :  { %2701 = vpow2.f32 %v2310_v55 }
 0xbb6   :  { %v2700_v54 = vpop.eup %2699 }
 0xbb7   :  { %884 = vrot.lane.b32.xlu1 %v2700_v54, %s2848_s20 }
 0xbb8   :  { %v2702_v56 = vpop.eup %2701 }
 0xbb9   :  { %v878_v57 = vadd.f32 1.0, %v2702_v56  ;;  %v1398_v56 = vld [vmem:[#allocation9 + $0x8] sm:$0xff] }
 0xbbb   :  { %2703 = vrcp.f32 %v878_v57 }
 0xbc8   :  { %v2704_v58 = vpop.eup %2703 }
 0xbc9   :  { %v882_v61 = vmul.f32 %v2704_v58, %v783_v45 }
 0xc29   :  { %v885_v59 = vpop.permute.xlu1 %884 }
 0xc2a   :  { %v887_v60 = vmul.f32 %v2704_v58, %v885_v59 }
 0xc2c   :  { %889 = vrot.lane.b32.xlu0 %v887_v60, %s2848_s20  ;;  %v343_v60 = vadd.f32 %v3048_v10, %v2981_v17 }
 0xc9e   :  { %v890_v62 = vpop.permute.xlu0 %889 }
 0xc9f   :  { %v892_v63 = vadd.f32 %v890_v62, %v882_v61 }
 0xca1   :  { %2705 = vtanh.f32 %v892_v63 }
 0xcae   :  { %v2706_v1 = vpop.eup %2705 }
 0xcaf   :  { %895 = vrot.lane.b32.xlu1 %v2706_v1, %s2848_s20 }
 0xd21   :  { %v896_v13 = vpop.permute.xlu1 %895 }
 0xd22   :  { %v898_v14 = vmul.f32 %v2704_v58, %v896_v13  ;;  %v1396_v58 = vld [vmem:[#allocation8 + $0x8] sm:$0xff] }
 0xd24   :  { %900 = vrot.lane.b32.xlu0 %v898_v14, %s2849_s21  ;;  %v3164_v14 = vld [vmem:[#allocation5 + $0x1] ss:$0 sm:$0xff] }
 0xd96   :  { %v901_v15 = vpop.permute.xlu0 %900 }
 0xd97   :  { %904 = vst.msk [vmem:[#allocation7 + $0x20] sm:$0xff] %vm194_vm0, %v901_v15  ;;  %2528 = vmatmul.mubr.msk.f32.vlgmr.msra.gmra.mxu1 %vm194_vm0, %v901_v15 }
 0xd98   :  { %2542 = vmatpush3.msra.mxu1 %v2906_v5  ;;  %2549 = vmatprep.mubr.msk.f32.mxu1 %vm2847_vm1, %v2846_v11  ;;  %v333_v5 = vadd.f32 %v3044_v0, %v2981_v17 }
 0xd99   :  { %2543 = vmatprep.subr.mxu1 %v2846_v11 }
 0xd9a   :  { %2544 = vmatpush3.msra.mxu1 %v2901_v4 }
 0xd9b   :  { %2545 = vmatprep.subr.mxu1 %v2846_v11 }
 0xd9c   :  { %2546 = vmatpush3.msra.mxu1 %v2896_v3 }
 0xd9d   :  { %2547 = vmatprep.subr.mxu1 %v2846_v11 }
 0xd9e   :  { %2548 = vmatpush3.msra.mxu1 %v2891_v2  ;;  %v1242_v38 = vld [vmem:[#allocation7 + $0x20] sm:$0xff] }
 0xd9f   :  { %2572 = vmatprep.subr.mxu1 %v2846_v11 }
 0xe57   :  { %v979_v16 = vpop.f32.mrf.mxu1 }
 0xe58   :  { %v983_v18 = vadd.f32 %v979_v16, %v333_v5 }
 0xe59   :  { %v2529_v19 = vpop.f32.mrf.mxu1 }
 0xe5a   :  { %2707 = vtanh.f32 %v983_v18  ;;  %v2312_v4 = vmul.f32 -1.442695, %v983_v18 }
 0xe5c   :  { %2709 = vpow2.f32 %v2312_v4 }
 0xe67   :  { %v2708_v20 = vpop.eup %2707 }
 0xe68   :  { %993 = vrot.lane.b32.xlu1 %v2708_v20, %s2848_s20 }
 0xe69   :  { %v2710_v21 = vpop.eup %2709 }
 0xe6a   :  { %v987_v3 = vadd.f32 1.0, %v2710_v21 }
 0xe6c   :  { %2711 = vrcp.f32 %v987_v3 }
 0xe79   :  { %v2712_v22 = vpop.eup %2711 }
 0xe7a   :  { %v991_v24 = vmul.f32 %v2712_v22, %v892_v63 }
 0xeda   :  { %v994_v23 = vpop.permute.xlu1 %993 }
 0xedb   :  { %v996_v2 = vmul.f32 %v2712_v22, %v994_v23 }
 0xedd   :  { %998 = vrot.lane.b32.xlu0 %v996_v2, %s2848_s20 }
 0xf4f   :  { %v999_v25 = vpop.permute.xlu0 %998 }
 0xf50   :  { %v1001_v0 = vadd.f32 %v999_v25, %v991_v24 }
 0xf52   :  { %2713 = vtanh.f32 %v1001_v0 }
 0xf5f   :  { %v2714_v27 = vpop.eup %2713 }
 0xf60   :  { %1004 = vrot.lane.b32.xlu1 %v2714_v27, %s2848_s20 }
 0xfd2   :  { %v1005_v28 = vpop.permute.xlu1 %1004 }
 0xfd3   :  { %v1007_v29 = vmul.f32 %v2712_v22, %v1005_v28 }
 0xfd5   :  { %1009 = vrot.lane.b32.xlu0 %v1007_v29, %s2849_s21 }
0x1047   :  { %v1010_v30 = vpop.permute.xlu0 %1009 }
0x1048   :  { %1013 = vst.msk [vmem:[#allocation7 + $0x28] sm:$0xff] %vm194_vm0, %v1010_v30  ;;  %2539 = vmatmul.mubr.msk.f32.vlgmr.msra.gmra.mxu0 %vm194_vm0, %v1010_v30 }
0x1049   :  { %2553 = vmatpush3.msra.mxu0 %v1249_v26  ;;  %2560 = vmatprep.mubr.msk.f32.mxu0 %vm194_vm0, %v1238_v32 }
0x104a   :  { %2554 = vmatprep.subr.mxu0 %v1248_v31 }
0x104b   :  { %2555 = vmatpush3.msra.mxu0 %v1248_v31 }
0x104c   :  { %2556 = vmatprep.subr.mxu0 %v1247_v33 }
0x104d   :  { %2557 = vmatpush3.msra.mxu0 %v1247_v33 }
0x104e   :  { %2558 = vmatprep.subr.mxu0 %v1246_v34 }
0x104f   :  { %2559 = vmatpush3.msra.mxu0 %v1246_v34  ;;  %v1243_v39 = vld [vmem:[#allocation7 + $0x28] sm:$0xff] }
0x1050   :  { %2561 = vmatmul.mubr.msk.f32.vlgmr.msra.gmra.mxu0 %vm194_vm0, %v1239_v35  ;;  %2594 = vmatprep.subr.mxu0 %v2846_v11 }
0x1051   :  { %2563 = vmatprep.mubr.msk.f32.mxu0 %vm194_vm0, %v1240_v36  ;;  %2595 = vmatpush3.msra.mxu0 %v2926_v9 }
0x1052   :  { %2596 = vmatprep.subr.mxu0 %v2846_v11 }
0x1053   :  { %2597 = vmatpush3.msra.mxu0 %v2921_v8 }
0x1054   :  { %2564 = vmatmul.mubr.msk.f32.gmra.mxu0 %vm194_vm0, %v1241_v37  ;;  %2598 = vmatprep.subr.mxu0 %v2846_v11 }
0x1055   :  { %2566 = vmatprep.mubr.msk.f32.mxu0 %vm194_vm0, %v1242_v38  ;;  %2599 = vmatpush3.msra.mxu0 %v2916_v7 }
0x1056   :  { %2600 = vmatprep.subr.mxu0 %v2846_v11 }
0x1057   :  { %2601 = vmatpush3.msra.mxu0 %v2911_v6 }
0x1058   :  { %2567 = vmatmul.mubr.msk.f32.gmra.mxu0 %vm194_vm0, %v1243_v39  ;;  %2616 = vmatprep.subr.mxu0 %v2846_v11 }
0x1108   :  { %v1088_v41 = vpop.f32.mrf.mxu0 }
0x1109   :  { %v1092_v42 = vadd.f32 %v1088_v41, %v338_v40 }
0x110a   :  { %v2540_v43 = vpop.f32.mrf.mxu0 }
0x110b   :  { %2715 = vtanh.f32 %v1092_v42  ;;  %v2314_v45 = vmul.f32 -1.442695, %v1092_v42 }
0x110d   :  { %2717 = vpow2.f32 %v2314_v45 }
0x1110   :  { %v3162_v61 = vpop.f32.mrf.mxu0 }
0x1111   :  { %v1354_v41 = vadd.f32 %v3162_v61, %v3164_v14 }
0x1112   :  { %v1348_v13 = vpop.f32.mrf.mxu0 }
0x1113   :  { %v1349_v15 = vadd.f32 %v3164_v14, %v1348_v13 }
0x1118   :  { %v2716_v44 = vpop.eup %2715 }
0x1119   :  { %1102 = vrot.lane.b32.xlu1 %v2716_v44, %s2848_s20 }
0x111a   :  { %v2718_v46 = vpop.eup %2717 }
0x111b   :  { %v1096_v47 = vadd.f32 1.0, %v2718_v46 }
0x111d   :  { %2719 = vrcp.f32 %v1096_v47 }
0x112a   :  { %v2720_v48 = vpop.eup %2719 }
0x112b   :  { %v1100_v51 = vmul.f32 %v2720_v48, %v1001_v0 }
0x118b   :  { %v1103_v49 = vpop.permute.xlu1 %1102 }
0x118c   :  { %v1105_v50 = vmul.f32 %v2720_v48, %v1103_v49 }
0x118e   :  { %1107 = vrot.lane.b32.xlu0 %v1105_v50, %s2848_s20 }
0x1200   :  { %v1108_v52 = vpop.permute.xlu0 %1107 }
0x1201   :  { %v3130_v12 = vadd.f32 %v1108_v52, %v1100_v51 }
0x1203   :  { %2721 = vtanh.f32 %v3130_v12 }
0x1210   :  { %v2722_v53 = vpop.eup %2721 }
0x1211   :  { %1113 = vrot.lane.b32.xlu1 %v2722_v53, %s2848_s20 }
0x1283   :  { %v1114_v54 = vpop.permute.xlu1 %1113 }
0x1284   :  { %v1116_v55 = vmul.f32 %v2720_v48, %v1114_v54 }
0x1286   :  { %1118 = vrot.lane.b32.xlu0 %v1116_v55, %s2849_s21 }
0x128a   :  { %1487 = vrot.lane.b32.xlu0 %v1398_v56, %s2848_s20 }
0x12f8   :  { %v1119_v57 = vpop.permute.xlu0 %1118 }
0x12f9   :  { %1122 = vst.msk [vmem:[#allocation7 + $0x30] sm:$0xff] %vm194_vm0, %v1119_v57  ;;  %2550 = vmatmul.mubr.msk.f32.vlgmr.msra.gmra.mxu1 %vm194_vm0, %v1119_v57 }
0x12fa   :  { %2573 = vmatpush3.msra.mxu1 %v2926_v9  ;;  %2580 = vmatprep.mubr.msk.f32.mxu1 %vm2847_vm1, %v2846_v11 }
0x12fb   :  { %2574 = vmatprep.subr.mxu1 %v2846_v11 }
0x12fc   :  { %2575 = vmatpush3.msra.mxu1 %v2921_v8  ;;  %v1488_v22 = vpop.permute.xlu0 %1487 }
0x12fd   :  { %2576 = vmatprep.subr.mxu1 %v2846_v11 }
0x12fe   :  { %2577 = vmatpush3.msra.mxu1 %v2916_v7 }
0x12ff   :  { %2578 = vmatprep.subr.mxu1 %v2846_v11 }
0x1300   :  { %2579 = vmatpush3.msra.mxu1 %v2911_v6  ;;  %v1244_v59 = vld [vmem:[#allocation7 + $0x30] sm:$0xff] }
0x1301   :  { %2581 = vmatmul.mubr.msk.f32.vlgmr.msra.gmra.mxu1 %vm194_vm0, %v1396_v58  ;;  %2569 = vmatprep.mubr.msk.f32.mxu0 %vm194_vm0, %v1244_v59 }
0x1302   :  { %2583 = vmatprep.subr.mxu1 %v2846_v11  ;;  %2591 = vmatprep.mubr.msk.f32.mxu1 %vm2847_vm1, %v2846_v11 }
0x1303   :  { %2584 = vmatpush3.msra.mxu1 %v2926_v9 }
0x1304   :  { %2585 = vmatprep.subr.mxu1 %v2846_v11 }
0x1305   :  { %2586 = vmatpush3.msra.mxu1 %v2921_v8 }
0x1306   :  { %2587 = vmatprep.subr.mxu1 %v2846_v11 }
0x1307   :  { %2588 = vmatpush3.msra.mxu1 %v2916_v7 }
0x1308   :  { %2589 = vmatprep.subr.mxu1 %v2846_v11 }
0x1309   :  { %2590 = vmatpush3.msra.mxu1 %v2911_v6 }
0x130a   :  { %2605 = vmatprep.subr.mxu1 %v2846_v11 }
0x13b9   :  { %v1197_v62 = vpop.f32.mrf.mxu1 }
0x13ba   :  { %v1201_v63 = vadd.f32 %v1197_v62, %v343_v60  ;;  %v2565_v60 = vpop.f32.mrf.mxu0 }
0x13bb   :  { %v2551_v1 = vpop.f32.mrf.mxu1 }
0x13bc   :  { %v2316_v26 = vmul.f32 -1.442695, %v1201_v63  ;;  %v1358_v61 = vpop.f32.mrf.mxu0 }
0x13be   :  { %v3212_v62 = vpop.f32.mrf.mxu0 }
0x13c1   :  { %v1474_v5 = vpop.f32.mrf.mxu1 }
0x13c2   :  { %v1478_v16 = vadd.f32 %v1474_v5, %v1349_v15  ;;  %v1359_v15 = vadd.f32 %v3164_v14, %v1358_v61 }
0x13c3   :  { %v2582_v18 = vpop.f32.mrf.mxu1 }
0x13c4   :  { %2723 = vtanh.f32 %v1478_v16  ;;  %v2327_v20 = vmul.f32 -1.442695, %v1478_v16 }
0x13c6   :  { %2725 = vpow2.f32 %v2327_v20 }
0x13d1   :  { %v2724_v19 = vpop.eup %2723 }
0x13d2   :  { %1492 = vrot.lane.b32.xlu1 %v2724_v19, %s2848_s20 }
0x13d3   :  { %v2726_v17 = vpop.eup %2725 }
0x13d4   :  { %v1482_v10 = vadd.f32 1.0, %v2726_v17 }
0x13d6   :  { %2727 = vrcp.f32 %v1482_v10 }
0x13e3   :  { %v2728_v4 = vpop.eup %2727 }
0x13e4   :  { %v1490_v23 = vmul.f32 %v2728_v4, %v1488_v22 }
0x1444   :  { %v1493_v21 = vpop.permute.xlu1 %1492 }
0x1445   :  { %v1495_v3 = vmul.f32 %v2728_v4, %v1493_v21 }
0x1447   :  { %1497 = vrot.lane.b32.xlu1 %v1495_v3, %s2848_s20 }
0x14b9   :  { %v1498_v2 = vpop.permute.xlu1 %1497 }
0x14ba   :  { %v1500_v24 = vadd.f32 %v1498_v2, %v1490_v23 }
0x14bc   :  { %2729 = vtanh.f32 %v1500_v24 }
0x14bd   :  { %2731 = vtanh.f32 %v1201_v63  ;;  %v3214_v63 = vpop.f32.mrf.mxu0 }
0x14be   :  { %2733 = vpow2.f32 %v2316_v26 }
0x14c9   :  { %v2730_v25 = vpop.eup %2729 }
0x14ca   :  { %1503 = vrot.lane.b32.xlu0 %v2730_v25, %s2848_s20  ;;  %v2732_v0 = vpop.eup %2731 }
0x14cb   :  { %v2734_v27 = vpop.eup %2733 }
0x14cc   :  { %v1205_v28 = vadd.f32 1.0, %v2734_v27  ;;  %v1364_v27 = vadd.f32 %v2565_v60, %v3164_v14 }
0x14ce   :  { %1211 = vrot.lane.b32.xlu0 %v2732_v0, %s2848_s20  ;;  %2735 = vrcp.f32 %v1205_v28 }
0x14db   :  { %v2736_v31 = vpop.eup %2735 }
0x14dc   :  { %v1209_v35 = vmul.f32 %v2736_v31, %v3130_v12 }
0x153c   :  { %v1504_v29 = vpop.permute.xlu0 %1503 }
0x153d   :  { %v1506_v30 = vmul.f32 %v2728_v4, %v1504_v29 }
0x153f   :  { %1509 = vrot.lane.b32.xlu1 %v1506_v30, %s2849_s21 }
0x1540   :  { %v1212_v32 = vpop.permute.xlu0 %1211 }
0x1541   :  { %v1214_v33 = vmul.f32 %v2736_v31, %v1212_v32 }
0x1543   :  { %1216 = vrot.lane.b32.xlu0 %v1214_v33, %s2848_s20 }
0x15b1   :  { %v1510_v34 = vpop.permute.xlu1 %1509 }
0x15b2   :  { %2592 = vmatmul.mubr.msk.f32.vlgmr.msra.gmra.mxu1 %vm194_vm0, %v1510_v34 }
0x15b3   :  { %2606 = vmatpush3.msra.mxu1 %v2926_v9  ;;  %2613 = vmatprep.mubr.msk.f32.mxu1 %vm2847_vm1, %v2846_v11 }
0x15b4   :  { %2607 = vmatprep.subr.mxu1 %v2846_v11 }
0x15b5   :  { %v1217_v36 = vpop.permute.xlu0 %1216  ;;  %2608 = vmatpush3.msra.mxu1 %v2921_v8 }
0x15b6   :  { %v3180_v37 = vadd.f32 %v1217_v36, %v1209_v35  ;;  %2609 = vmatprep.subr.mxu1 %v2846_v11 }
0x15b7   :  { %2610 = vmatpush3.msra.mxu1 %v2916_v7 }
0x15b8   :  { %2737 = vtanh.f32 %v3180_v37  ;;  %2611 = vmatprep.subr.mxu1 %v2846_v11 }
0x15b9   :  { %2612 = vmatpush3.msra.mxu1 %v2911_v6 }
0x15ba   :  { %2627 = vmatprep.subr.mxu1 %v2846_v11 }
0x15c5   :  { %v2738_v38 = vpop.eup %2737 }
0x15c6   :  { %1222 = vrot.lane.b32.xlu0 %v2738_v38, %s2848_s20 }
0x1638   :  { %v1223_v39 = vpop.permute.xlu0 %1222 }
0x1639   :  { %v1225_v40 = vmul.f32 %v2736_v31, %v1223_v39 }
0x163b   :  { %1227 = vrot.lane.b32.xlu0 %v1225_v40, %s2849_s21 }
0x1672   :  { %v1579_v42 = vpop.f32.mrf.mxu1 }
0x1673   :  { %v1583_v43 = vadd.f32 %v1579_v42, %v1354_v41 }
0x1674   :  { %v2593_v44 = vpop.f32.mrf.mxu1 }
0x1675   :  { %2739 = vtanh.f32 %v1583_v43  ;;  %v2329_v48 = vmul.f32 -1.442695, %v1583_v43 }
0x1677   :  { %2741 = vpow2.f32 %v2329_v48 }
0x1682   :  { %v2740_v45 = vpop.eup %2739 }
0x1683   :  { %1593 = vrot.lane.b32.xlu1 %v2740_v45, %s2848_s20 }
0x1684   :  { %v2742_v49 = vpop.eup %2741 }
0x1685   :  { %v1587_v50 = vadd.f32 1.0, %v2742_v49 }
0x1687   :  { %2743 = vrcp.f32 %v1587_v50 }
0x1694   :  { %v2744_v51 = vpop.eup %2743 }
0x1695   :  { %v1591_v53 = vmul.f32 %v2744_v51, %v1500_v24 }
0x16ad   :  { %v1228_v46 = vpop.permute.xlu0 %1227 }
0x16ae   :  { %1231 = vst.msk [vmem:[#allocation7 + $0x38] sm:$0xff] %vm194_vm0, %v1228_v46  ;;  %1232 = vst.msk [vmem:[#allocation8] sm:$0xff] %vm194_vm0, %v1228_v46  ;;  %v1369_v46 = vadd.f32 %v3164_v14, %v3214_v63 }
0x16b5   :  { %v1245_v47 = vld [vmem:[#allocation7 + $0x38] sm:$0xff] }
0x16b6   :  { %2570 = vmatmul.mubr.msk.f32.gmra.mxu0 %vm194_vm0, %v1245_v47 }
0x16b7   :  { %2602 = vmatprep.mubr.msk.f32.mxu0 %vm2847_vm1, %v2846_v11 }
0x16f5   :  { %v1594_v52 = vpop.permute.xlu1 %1593 }
0x16f6   :  { %v1596_v12 = vmul.f32 %v2744_v51, %v1594_v52 }
0x16f8   :  { %1598 = vrot.lane.b32.xlu1 %v1596_v12, %s2848_s20 }
0x176a   :  { %v1599_v54 = vpop.permute.xlu1 %1598 }
0x176b   :  { %v1601_v55 = vadd.f32 %v1599_v54, %v1591_v53 }
0x176d   :  { %2745 = vtanh.f32 %v1601_v55 }
0x1776   :  { %v3216_v1 = vpop.f32.mrf.mxu0 }
0x1778   :  { %v3218_v13 = vpop.f32.mrf.mxu0 }
0x177a   :  { %v2746_v56 = vpop.eup %2745 }
0x177b   :  { %1604 = vrot.lane.b32.xlu1 %v2746_v56, %s2848_s20 }
0x17ed   :  { %v1605_v57 = vpop.permute.xlu1 %1604 }
0x17ee   :  { %v1607_v58 = vmul.f32 %v2744_v51, %v1605_v57 }
0x17f0   :  { %1610 = vrot.lane.b32.xlu1 %v1607_v58, %s2849_s21 }
0x1862   :  { %v1611_v59 = vpop.permute.xlu1 %1610 }
0x1863   :  { %2603 = vmatmul.mubr.msk.f32.vlgmr.msra.gmra.mxu0 %vm194_vm0, %v1611_v59 }
0x1864   :  { %2617 = vmatpush3.msra.mxu0 %v2926_v9  ;;  %2624 = vmatprep.mubr.msk.f32.mxu0 %vm2847_vm1, %v2846_v11 }
0x1865   :  { %2618 = vmatprep.subr.mxu0 %v2846_v11 }
0x1866   :  { %2619 = vmatpush3.msra.mxu0 %v2921_v8 }
0x1867   :  { %2620 = vmatprep.subr.mxu0 %v2846_v11 }
0x1868   :  { %2621 = vmatpush3.msra.mxu0 %v2916_v7 }
0x1869   :  { %2622 = vmatprep.subr.mxu0 %v2846_v11 }
0x186a   :  { %2623 = vmatpush3.msra.mxu0 %v2911_v6 }
0x186b   :  { %2638 = vmatprep.subr.mxu0 %v2846_v11 }
0x1923   :  { %v1680_v5 = vpop.f32.mrf.mxu0 }
0x1924   :  { %v1684_v16 = vadd.f32 %v1680_v5, %v1359_v15  ;;  %v1374_v15 = vadd.f32 %v3212_v62, %v3164_v14 }
0x1925   :  { %v2604_v18 = vpop.f32.mrf.mxu0 }
0x1926   :  { %2747 = vtanh.f32 %v1684_v16  ;;  %v2331_v20 = vmul.f32 -1.442695, %v1684_v16 }
0x1928   :  { %2749 = vpow2.f32 %v2331_v20 }
0x1933   :  { %v2748_v19 = vpop.eup %2747 }
0x1934   :  { %1694 = vrot.lane.b32.xlu0 %v2748_v19, %s2848_s20 }
0x1935   :  { %v2750_v17 = vpop.eup %2749 }
0x1936   :  { %v1688_v10 = vadd.f32 1.0, %v2750_v17 }
0x1938   :  { %2751 = vrcp.f32 %v1688_v10 }
0x1945   :  { %v2752_v4 = vpop.eup %2751 }
0x1946   :  { %v1692_v22 = vmul.f32 %v2752_v4, %v1601_v55 }
0x19a6   :  { %v1695_v21 = vpop.permute.xlu0 %1694 }
0x19a7   :  { %v1697_v3 = vmul.f32 %v2752_v4, %v1695_v21 }
0x19a9   :  { %1699 = vrot.lane.b32.xlu1 %v1697_v3, %s2848_s20 }
0x1a1b   :  { %v1700_v23 = vpop.permute.xlu1 %1699 }
0x1a1c   :  { %v1702_v2 = vadd.f32 %v1700_v23, %v1692_v22  ;;  %v1379_v23 = vadd.f32 %v3164_v14, %v3218_v13 }
0x1a1e   :  { %2753 = vtanh.f32 %v1702_v2 }
0x1a2b   :  { %v2754_v24 = vpop.eup %2753 }
0x1a2c   :  { %1705 = vrot.lane.b32.xlu0 %v2754_v24, %s2848_s20 }
0x1a9e   :  { %v1706_v25 = vpop.permute.xlu0 %1705 }
0x1a9f   :  { %v1708_v0 = vmul.f32 %v2752_v4, %v1706_v25 }
0x1aa1   :  { %1711 = vrot.lane.b32.xlu1 %v1708_v0, %s2849_s21 }
0x1b13   :  { %v1712_v26 = vpop.permute.xlu1 %1711 }
0x1b14   :  { %2614 = vmatmul.mubr.msk.f32.vlgmr.msra.gmra.mxu1 %vm194_vm0, %v1712_v26 }
0x1b15   :  { %2628 = vmatpush3.msra.mxu1 %v2926_v9  ;;  %2635 = vmatprep.mubr.msk.f32.mxu1 %vm2847_vm1, %v2846_v11 }
0x1b16   :  { %2629 = vmatprep.subr.mxu1 %v2846_v11 }
0x1b17   :  { %2630 = vmatpush3.msra.mxu1 %v2921_v8 }
0x1b18   :  { %2631 = vmatprep.subr.mxu1 %v2846_v11 }
0x1b19   :  { %2632 = vmatpush3.msra.mxu1 %v2916_v7 }
0x1b1a   :  { %2633 = vmatprep.subr.mxu1 %v2846_v11 }
0x1b1b   :  { %2634 = vmatpush3.msra.mxu1 %v2911_v6 }
0x1b1c   :  { %2649 = vmatprep.subr.mxu1 %v2846_v11 }
0x1bd4   :  { %v1781_v28 = vpop.f32.mrf.mxu1 }
0x1bd5   :  { %v1785_v29 = vadd.f32 %v1781_v28, %v1364_v27 }
0x1bd6   :  { %v2615_v30 = vpop.f32.mrf.mxu1 }
0x1bd7   :  { %2755 = vtanh.f32 %v1785_v29  ;;  %v2333_v32 = vmul.f32 -1.442695, %v1785_v29 }
0x1bd9   :  { %2757 = vpow2.f32 %v2333_v32 }
0x1be4   :  { %v2756_v31 = vpop.eup %2755 }
0x1be5   :  { %1795 = vrot.lane.b32.xlu0 %v2756_v31, %s2848_s20 }
0x1be6   :  { %v2758_v33 = vpop.eup %2757 }
0x1be7   :  { %v1789_v34 = vadd.f32 1.0, %v2758_v33 }
0x1be9   :  { %2759 = vrcp.f32 %v1789_v34 }
0x1bf6   :  { %v2760_v35 = vpop.eup %2759 }
0x1bf7   :  { %v1793_v39 = vmul.f32 %v2760_v35, %v1702_v2 }
0x1c57   :  { %v1796_v36 = vpop.permute.xlu0 %1795 }
0x1c58   :  { %v1798_v38 = vmul.f32 %v2760_v35, %v1796_v36 }
0x1c5a   :  { %1800 = vrot.lane.b32.xlu1 %v1798_v38, %s2848_s20 }
0x1ccc   :  { %v1801_v40 = vpop.permute.xlu1 %1800 }
0x1ccd   :  { %v1803_v41 = vadd.f32 %v1801_v40, %v1793_v39  ;;  %v1384_v39 = vadd.f32 %v3216_v1, %v3164_v14 }
0x1ccf   :  { %2761 = vtanh.f32 %v1803_v41 }
0x1cdc   :  { %v2762_v42 = vpop.eup %2761 }
0x1cdd   :  { %1806 = vrot.lane.b32.xlu0 %v2762_v42, %s2848_s20 }
0x1d4f   :  { %v1807_v43 = vpop.permute.xlu0 %1806 }
0x1d50   :  { %v1809_v44 = vmul.f32 %v2760_v35, %v1807_v43 }
0x1d52   :  { %1812 = vrot.lane.b32.xlu1 %v1809_v44, %s2849_s21 }
0x1dc4   :  { %v1813_v45 = vpop.permute.xlu1 %1812 }
0x1dc5   :  { %2625 = vmatmul.mubr.msk.f32.vlgmr.msra.gmra.mxu0 %vm194_vm0, %v1813_v45 }
0x1dc6   :  { %2639 = vmatpush3.msra.mxu0 %v2926_v9  ;;  %2646 = vmatprep.mubr.msk.f32.mxu0 %vm2847_vm1, %v2846_v11 }
0x1dc7   :  { %2640 = vmatprep.subr.mxu0 %v2846_v11 }
0x1dc8   :  { %2641 = vmatpush3.msra.mxu0 %v2921_v8 }
0x1dc9   :  { %2642 = vmatprep.subr.mxu0 %v2846_v11 }
0x1dca   :  { %2643 = vmatpush3.msra.mxu0 %v2916_v7 }
0x1dcb   :  { %2644 = vmatprep.subr.mxu0 %v2846_v11 }
0x1dcc   :  { %2645 = vmatpush3.msra.mxu0 %v2911_v6 }
0x1e85   :  { %v1882_v47 = vpop.f32.mrf.mxu0 }
0x1e86   :  { %v1886_v48 = vadd.f32 %v1882_v47, %v1369_v46 }
0x1e87   :  { %v2626_v49 = vpop.f32.mrf.mxu0 }
0x1e88   :  { %2763 = vtanh.f32 %v1886_v48  ;;  %v2335_v51 = vmul.f32 -1.442695, %v1886_v48 }
0x1e8a   :  { %2765 = vpow2.f32 %v2335_v51 }
0x1e95   :  { %v2764_v50 = vpop.eup %2763 }
0x1e96   :  { %1896 = vrot.lane.b32.xlu0 %v2764_v50, %s2848_s20 }
0x1e97   :  { %v2766_v52 = vpop.eup %2765 }
0x1e98   :  { %v1890_v12 = vadd.f32 1.0, %v2766_v52 }
0x1e9a   :  { %2767 = vrcp.f32 %v1890_v12 }
0x1ea7   :  { %v2768_v53 = vpop.eup %2767 }
0x1ea8   :  { %v1894_v56 = vmul.f32 %v2768_v53, %v1803_v41 }
0x1f08   :  { %v1897_v54 = vpop.permute.xlu0 %1896 }
0x1f09   :  { %v1899_v55 = vmul.f32 %v2768_v53, %v1897_v54 }
0x1f0b   :  { %1901 = vrot.lane.b32.xlu1 %v1899_v55, %s2848_s20 }
0x1f7d   :  { %v1902_v57 = vpop.permute.xlu1 %1901 }
0x1f7e   :  { %v1904_v58 = vadd.f32 %v1902_v57, %v1894_v56 }
0x1f80   :  { %2769 = vtanh.f32 %v1904_v58 }
0x1f8d   :  { %v2770_v59 = vpop.eup %2769 }
0x1f8e   :  { %1907 = vrot.lane.b32.xlu0 %v2770_v59, %s2848_s20 }
0x2000   :  { %v1908_v60 = vpop.permute.xlu0 %1907 }
0x2001   :  { %v1910_v61 = vmul.f32 %v2768_v53, %v1908_v60 }
0x2003   :  { %1913 = vrot.lane.b32.xlu1 %v1910_v61, %s2849_s21 }
0x2075   :  { %v1914_v63 = vpop.permute.xlu1 %1913 }
0x2076   :  { %2636 = vmatmul.mubr.msk.f32.vlgmr.msra.gmra.mxu1 %vm194_vm0, %v1914_v63 }
0x2077   :  { %2650 = vmatpush3.msra.mxu1 %v2926_v9  ;;  %2657 = vmatprep.mubr.msk.f32.mxu1 %vm2847_vm1, %v2846_v11 }
0x2078   :  { %2651 = vmatprep.subr.mxu1 %v2846_v11 }
0x2079   :  { %2652 = vmatpush3.msra.mxu1 %v2921_v8 }
0x207a   :  { %2653 = vmatprep.subr.mxu1 %v2846_v11 }
0x207b   :  { %2654 = vmatpush3.msra.mxu1 %v2916_v7 }
0x207c   :  { %2655 = vmatprep.subr.mxu1 %v2846_v11 }
0x207d   :  { %2656 = vmatpush3.msra.mxu1 %v2911_v6 }
0x2136   :  { %v1983_v5 = vpop.f32.mrf.mxu1 }
0x2137   :  { %v1987_v9 = vadd.f32 %v1983_v5, %v1374_v15 }
0x2138   :  { %v2637_v16 = vpop.f32.mrf.mxu1 }
0x2139   :  { %2771 = vtanh.f32 %v1987_v9  ;;  %v2337_v19 = vmul.f32 -1.442695, %v1987_v9 }
0x213b   :  { %2773 = vpow2.f32 %v2337_v19 }
0x2146   :  { %v2772_v18 = vpop.eup %2771 }
0x2147   :  { %1997 = vrot.lane.b32.xlu0 %v2772_v18, %s2848_s20 }
0x2148   :  { %v2774_v8 = vpop.eup %2773 }
0x2149   :  { %v1991_v20 = vadd.f32 1.0, %v2774_v8 }
0x214b   :  { %2775 = vrcp.f32 %v1991_v20 }
0x2158   :  { %v2776_v7 = vpop.eup %2775 }
0x2159   :  { %v1995_v6 = vmul.f32 %v2776_v7, %v1904_v58 }
0x21b9   :  { %v1998_v17 = vpop.permute.xlu0 %1997 }
0x21ba   :  { %v2000_v11 = vmul.f32 %v2776_v7, %v1998_v17 }
0x21bc   :  { %2002 = vrot.lane.b32.xlu1 %v2000_v11, %s2848_s20 }
0x222e   :  { %v2003_v10 = vpop.permute.xlu1 %2002 }
0x222f   :  { %v2005_v62 = vadd.f32 %v2003_v10, %v1995_v6 }
0x2231   :  { %2777 = vtanh.f32 %v2005_v62 }
0x223e   :  { %v2778_v4 = vpop.eup %2777 }
0x223f   :  { %2008 = vrot.lane.b32.xlu0 %v2778_v4, %s2848_s20 }
0x22b1   :  { %v2009_v21 = vpop.permute.xlu0 %2008 }
0x22b2   :  { %v2011_v3 = vmul.f32 %v2776_v7, %v2009_v21 }
0x22b4   :  { %2014 = vrot.lane.b32.xlu1 %v2011_v3, %s2849_s21 }
0x2326   :  { %v2015_v22 = vpop.permute.xlu1 %2014 }
0x2327   :  { %2647 = vmatmul.mubr.msk.f32.vlgmr.msra.gmra.mxu0 %vm194_vm0, %v2015_v22 }
0x23e7   :  { %v2084_v2 = vpop.f32.mrf.mxu0 }
0x23e8   :  { %v2088_v24 = vadd.f32 %v2084_v2, %v1379_v23 }
0x23e9   :  { %v2648_v25 = vpop.f32.mrf.mxu0 }
0x23ea   :  { %2779 = vtanh.f32 %v2088_v24  ;;  %v2339_v26 = vmul.f32 -1.442695, %v2088_v24 }
0x23ec   :  { %2781 = vpow2.f32 %v2339_v26 }
0x23f7   :  { %v2780_v0 = vpop.eup %2779 }
0x23f8   :  { %2098 = vrot.lane.b32.xlu0 %v2780_v0, %s2848_s20 }
0x23f9   :  { %v2782_v27 = vpop.eup %2781 }
0x23fa   :  { %v2092_v28 = vadd.f32 1.0, %v2782_v27 }
0x23fc   :  { %2783 = vrcp.f32 %v2092_v28 }
0x2409   :  { %v2784_v29 = vpop.eup %2783 }
0x240a   :  { %v2096_v32 = vmul.f32 %v2784_v29, %v2005_v62 }
0x246a   :  { %v2099_v30 = vpop.permute.xlu0 %2098 }
0x246b   :  { %v2101_v31 = vmul.f32 %v2784_v29, %v2099_v30 }
0x246d   :  { %2103 = vrot.lane.b32.xlu1 %v2101_v31, %s2848_s20 }
0x24df   :  { %v2104_v33 = vpop.permute.xlu1 %2103 }
0x24e0   :  { %v2106_v13 = vadd.f32 %v2104_v33, %v2096_v32 }
0x24e2   :  { %2785 = vtanh.f32 %v2106_v13 }
0x24ef   :  { %v2786_v34 = vpop.eup %2785 }
0x24f0   :  { %2109 = vrot.lane.b32.xlu0 %v2786_v34, %s2848_s20 }
0x2562   :  { %v2110_v35 = vpop.permute.xlu0 %2109 }
0x2563   :  { %v2112_v36 = vmul.f32 %v2784_v29, %v2110_v35 }
0x2565   :  { %2115 = vrot.lane.b32.xlu1 %v2112_v36, %s2849_s21 }
0x25d7   :  { %v2116_v38 = vpop.permute.xlu1 %2115 }
0x25d8   :  { %2658 = vmatmul.mubr.msk.f32.vlgmr.msra.gmra.mxu1 %vm194_vm0, %v2116_v38 }
0x2698   :  { %v2185_v40 = vpop.f32.mrf.mxu1 }
0x2699   :  { %v2189_v41 = vadd.f32 %v2185_v40, %v1384_v39 }
0x269a   :  { %v2659_v42 = vpop.f32.mrf.mxu1 }
0x269b   :  { %2787 = vtanh.f32 %v2189_v41  ;;  %v2341_v44 = vmul.f32 -1.442695, %v2189_v41 }
0x269d   :  { %2789 = vpow2.f32 %v2341_v44 }
0x26a8   :  { %v2788_v43 = vpop.eup %2787 }
0x26a9   :  { %2199 = vrot.lane.b32.xlu0 %v2788_v43, %s2848_s20 }
0x26aa   :  { %v2790_v45 = vpop.eup %2789 }
0x26ab   :  { %v2193_v46 = vadd.f32 1.0, %v2790_v45 }
0x26ad   :  { %2791 = vrcp.f32 %v2193_v46 }
0x26ba   :  { %v2792_v47 = vpop.eup %2791 }
0x26bb   :  { %v2197_v50 = vmul.f32 %v2792_v47, %v2106_v13 }
0x271b   :  { %v2200_v48 = vpop.permute.xlu0 %2199 }
0x271c   :  { %v2202_v49 = vmul.f32 %v2792_v47, %v2200_v48 }
0x271e   :  { %2204 = vrot.lane.b32.xlu1 %v2202_v49, %s2848_s20 }
0x2790   :  { %v2205_v51 = vpop.permute.xlu1 %2204 }
0x2791   :  { %v2207_v14 = vadd.f32 %v2205_v51, %v2197_v50 }
0x2793   :  { %2793 = vtanh.f32 %v2207_v14 }
0x27a0   :  { %v2794_v1 = vpop.eup %2793 }
0x27a1   :  { %2210 = vrot.lane.b32.xlu0 %v2794_v1, %s2848_s20 }
0x27a5   :  { %1234 = vrot.lane.b32.xlu0 %v3180_v37, %s2850_s0 }
0x2813   :  { %v2211_v52 = vpop.permute.xlu0 %2210 }
0x2814   :  { %v2213_v12 = vmul.f32 %v2792_v47, %v2211_v52 }
0x2816   :  { %2215 = vrot.lane.b32.xlu1 %v2213_v12, %s2849_s21 }
0x2817   :  { %v1235_v53 = vpop.permute.xlu0 %1234 }
0x2818   :  { %1237 = vst.msk [vmem:[#allocation9] sm:$0xff] %vm194_vm0, %v1235_v53 }
0x281a   :  { %2220 = vrot.lane.b32.xlu1 %v2207_v14, %s2850_s0 }
0x2888   :  { %v2216_v54 = vpop.permute.xlu1 %2215 }
0x2889   :  { %2218 = vst.msk [vmem:[#allocation8 + $0x8] sm:$0xff] %vm194_vm0, %v2216_v54  ;;  %2224 = vst.msk [vmem:[#allocation11] sm:$0xff] %vm194_vm0, %v2216_v54 }
0x288a   :  { %2826 = shalt.err (!%p2823_p9)
}
0x288b   :  { %2234 = dma.vmem_to_hbm [thread:$0]  %s2232_s9, 128, %s3300_s5, [#allocation12]  }
0x288c   :  { %v2221_v37 = vpop.permute.xlu1 %2220 }
0x288d   :  { %2223 = vst.msk [vmem:[#allocation9 + $0x8] sm:$0xff] %vm194_vm0, %v2221_v37 }
0x288e   :  { %2843 = dma.done.wait [#allocation12], 128  }
0x288f   :  { %2844 = vsyncadd [#allocation12], 4294967168 }
0x2890   :  { %2238 = vsyncpa [#allocation12], 1 }
0x2891   :  { %2239 = vsyncmov [#allocation10] }
0x2894   :  { %s2240_s13 = vpop.sfrf %2239 }
0x2895   :  { %p2342_p10 = scmp.ne.s32.totalorder %s2240_s13, 0 }
0x2897   :  { %2244 = shalt.err (%p2342_p10)  }
0x2898   :  { %2246 = vsyncmov [#allocation10 + $0x1] }
0x289b   :  { %s2247_s14 = vpop.sfrf %2246 }
0x289c   :  { %p2343_p11 = scmp.ne.s32.totalorder %s2247_s14, 0 }
0x289e   :  { %2251 = shalt.err (%p2343_p11)  }
0x289f   :  { %2253 = vsyncmov [#allocation10 + $0x2] }
0x28a2   :  { %s2254_s15 = vpop.sfrf %2253 }
0x28a3   :  { %p2344_p12 = scmp.ne.s32.totalorder %s2254_s15, 0 }
0x28a5   :  { %2258 = shalt.err (%p2344_p12)  }
0x28a6   :  { %2260 = vsyncmov [#allocation10 + $0x3] }
0x28a9   :  { %s2261_s5 = vpop.sfrf %2260 }
0x28aa   :  { %p2345_p13 = scmp.ne.s32.totalorder %s2261_s5, 0 }
0x28ac   :  { %2265 = shalt.err (%p2345_p13)  }

</bundles_post_ra>
